<compile_context>
chip_gen: v7x
topology: tpu7x:2x2x1
jax: 0.10.0
libtpu: 0.0.40
codegen_flags: <defaults>
</compile_context>

<pallas_src>
import math

import jax
import jax.numpy as jnp
from jax import lax
from jax.experimental import pallas as pl
from jax.experimental.pallas import tpu as pltpu  # noqa: F401

# ---- module hyperparameters (consistent with the PyTorch module) ----
MODEL_DIM = 32      # d_model
NUM_HEADS = 4       # h
FFN_DIM   = 64      # d_ff
KEY_DIM   = 12      # hardcoded in MultiHeadAttention.__init__
VALUE_DIM = 32      # hardcoded in MultiHeadAttention.__init__
SEQ_LEN   = 8
BATCH     = 2
EPS       = 1e-6    # LayerNorm eps (added to std, not var — matches the PyTorch code)


def _layer_norm_ref(z, gamma, beta):
    """torch-style LayerNorm: a*(x-mean)/(std+eps)+b, unbiased std (ddof=1)."""
    d = z.shape[-1]
    mean = jnp.mean(z, axis=-1, keepdims=True)
    var = jnp.sum((z - mean) ** 2, axis=-1, keepdims=True) / (d - 1)
    return gamma * (z - mean) / (jnp.sqrt(var) + EPS) + beta


def _layer_norm_kernel(z, gamma, beta):
    """Same math as _layer_norm_ref but the divide goes through the EUP."""
    d = z.shape[-1]
    mean = jnp.mean(z, axis=-1, keepdims=True)
    var = jnp.sum((z - mean) ** 2, axis=-1, keepdims=True) * (1.0 / (d - 1))
    inv = pl.reciprocal(jnp.sqrt(var) + EPS, approx=True)
    return gamma * (z - mean) * inv + beta


def encoder_layer_kernel(
    x_ref,                 # (B*S, D)
    wqkv_ref, bqkv_ref,    # (D, 2*H*Kd + H*Vd), (1, 2*H*Kd + H*Vd)
    wx_ref, bx_ref,        # (H*Vd, D), (1, D)
    w1_ref, b1_ref,        # (D, F),    (1, F)
    w2_ref, b2_ref,        # (F, D),    (1, D)
    ga_ref, gb_ref,        # (1, D),    (1, D)   shared LayerNorm params
    out_ref,               # (B*S, D)
    attn_ref,              # (B*S, H*S)   [b*S+i, h*S+j] = p_attn[b, h, i, j]
):
    n_rows, d_model = x_ref.shape
    seq = attn_ref.shape[1] // NUM_HEADS
    batch = n_rows // seq

    x = x_ref[...]                       # (B*S, D)
    ga = ga_ref[...]
    gb = gb_ref[...]

    # ---- norm_inputs = LayerNorm(inputs) (both batch items at once) ----
    nx = _layer_norm_kernel(x, ga, gb)

    # ---- fused Q/K/V projection: one matmul, columns = [Q | K | V] ----
    qkv = jnp.dot(nx, wqkv_ref[...], preferred_element_type=jnp.float32) + bqkv_ref[...]
    wx = wx_ref[...]                     # (H*Vd, D)

    q_off = 0
    k_off = NUM_HEADS * KEY_DIM
    v_off = 2 * NUM_HEADS * KEY_DIM
    scale = 1.0 / math.sqrt(KEY_DIM)
    dn = (((1,), (1,)), ((), ()))        # contract last dims: q @ k^T without .T

    attn_out_blocks = []
    for b in range(batch):               # static unrolled loop over batch items
        r0 = b * seq
        qkv_b = qkv[r0:r0 + seq, :]      # (S, 224) — sublane-aligned row slice
        ao = jnp.zeros((seq, d_model), jnp.float32)
        p_heads = []
        for h in range(NUM_HEADS):       # static unrolled loop over heads
            qh = qkv_b[:, q_off + h * KEY_DIM:q_off + (h + 1) * KEY_DIM] * scale
            kh = qkv_b[:, k_off + h * KEY_DIM:k_off + (h + 1) * KEY_DIM]
            vh = qkv_b[:, v_off + h * VALUE_DIM:v_off + (h + 1) * VALUE_DIM]
            s = lax.dot_general(qh, kh, dn, preferred_element_type=jnp.float32)  # (S, S)
            s = s - jnp.max(s, axis=-1, keepdims=True)
            e = jnp.exp(s)
            p = e * pl.reciprocal(jnp.sum(e, axis=-1, keepdims=True), approx=True)
            p_heads.append(p)
            ctx_h = jnp.dot(p, vh, preferred_element_type=jnp.float32)           # (S, Vd)
            # Accumulate the output projection per head over sublane-aligned
            # row slices of W_x (replaces concat(ctx_heads) @ W_x).
            ao = ao + jnp.dot(ctx_h, wx[h * VALUE_DIM:(h + 1) * VALUE_DIM, :],
                              preferred_element_type=jnp.float32)
        # One contiguous store of all heads' probs for this batch item.
        attn_ref[r0:r0 + seq, :] = jnp.concatenate(p_heads, axis=-1)             # (S, H*S)
        attn_out_blocks.append(ao + bx_ref[...])

    attn_out = jnp.concatenate(attn_out_blocks, axis=0)                          # (B*S, D)

    # ---- residual add (dropout p=0.0 -> identity) ----
    context = x + attn_out

    # ---- second LayerNorm + position-wise FFN + residual ----
    n2 = _layer_norm_kernel(context, ga, gb)
    hdn = jnp.maximum(
        jnp.dot(n2, w1_ref[...], preferred_element_type=jnp.float32) + b1_ref[...], 0.0)
    ffn = jnp.dot(hdn, w2_ref[...], preferred_element_type=jnp.float32) + b2_ref[...]

    out_ref[...] = context + ffn


@jax.jit
def encoder_layer(x, params):
    """x: (B, S, D) float32. Returns (output (B,S,D), p_attn (B,h,S,S))."""
    B, S, D = x.shape
    x_flat = x.reshape(B * S, D)
    # Fuse q/k/v projection weights (layout plumbing outside the kernel).
    w_qkv = jnp.concatenate([params["wq"], params["wk"], params["wv"]], axis=1)
    b_qkv = jnp.concatenate([params["bq"], params["bk"], params["bv"]], axis=1)

    out_flat, attn_flat = pl.pallas_call(
        encoder_layer_kernel,
        out_shape=(
            jax.ShapeDtypeStruct((B * S, D), jnp.float32),
            jax.ShapeDtypeStruct((B * S, NUM_HEADS * S), jnp.float32),
        ),
    )(x_flat, w_qkv, b_qkv,
      params["wx"], params["bx"],
      params["w1"], params["b1"],
      params["w2"], params["b2"],
      params["ln_a"], params["ln_b"])

    out = out_flat.reshape(B, S, D)
    p_attn = attn_flat.reshape(B, S, NUM_HEADS, S).transpose(0, 2, 1, 3)
    return out, p_attn


def encoder_layer_ref(x, params):
    """Pure-JAX reference mirroring the PyTorch forward (mask=None, dropout off)."""
    B, S, D = x.shape
    ga, gb = params["ln_a"], params["ln_b"]

    def ln(z):
        return _layer_norm_ref(z, ga, gb)

    nx = ln(x)
    q = nx @ params["wq"] + params["bq"]
    k = nx @ params["wk"] + params["bk"]
    v = nx @ params["wv"] + params["bv"]
    q = q.reshape(B, S, NUM_HEADS, KEY_DIM).transpose(0, 2, 1, 3)
    k = k.reshape(B, S, NUM_HEADS, KEY_DIM).transpose(0, 2, 1, 3)
    v = v.reshape(B, S, NUM_HEADS, VALUE_DIM).transpose(0, 2, 1, 3)
    scores = jnp.einsum("bhqd,bhkd->bhqk", q, k) / math.sqrt(KEY_DIM)
    p = jax.nn.softmax(scores, axis=-1)
    ctx = jnp.einsum("bhqk,bhkd->bhqd", p, v)
    ctx = ctx.transpose(0, 2, 1, 3).reshape(B, S, NUM_HEADS * VALUE_DIM)
    attn_out = ctx @ params["wx"] + params["bx"]
    context = x + attn_out
    n2 = ln(context)
    ffn = jnp.maximum(n2 @ params["w1"] + params["b1"], 0.0) @ params["w2"] + params["b2"]
    return context + ffn, p


def init_params(key):
    ks = jax.random.split(key, 12)

    def lin(k, fan_in, fan_out):
        s = 1.0 / math.sqrt(fan_in)
        return jax.random.uniform(k, (fan_in, fan_out), jnp.float32, -s, s)

    return {
        "wq": lin(ks[0], MODEL_DIM, NUM_HEADS * KEY_DIM),
        "bq": jax.random.uniform(ks[1], (1, NUM_HEADS * KEY_DIM), jnp.float32, -0.1, 0.1),
        "wk": lin(ks[2], MODEL_DIM, NUM_HEADS * KEY_DIM),
        "bk": jax.random.uniform(ks[3], (1, NUM_HEADS * KEY_DIM), jnp.float32, -0.1, 0.1),
        "wv": lin(ks[4], MODEL_DIM, NUM_HEADS * VALUE_DIM),
        "bv": jax.random.uniform(ks[5], (1, NUM_HEADS * VALUE_DIM), jnp.float32, -0.1, 0.1),
        "wx": lin(ks[6], NUM_HEADS * VALUE_DIM, MODEL_DIM),
        "bx": jax.random.uniform(ks[7], (1, MODEL_DIM), jnp.float32, -0.1, 0.1),
        "w1": lin(ks[8], MODEL_DIM, FFN_DIM),
        "b1": jax.random.uniform(ks[9], (1, FFN_DIM), jnp.float32, -0.1, 0.1),
        "w2": lin(ks[10], FFN_DIM, MODEL_DIM),
        "b2": jax.random.uniform(ks[11], (1, MODEL_DIM), jnp.float32, -0.1, 0.1),
        "ln_a": jnp.ones((1, MODEL_DIM), jnp.float32),    # torch.ones(n_features)
        "ln_b": jnp.zeros((1, MODEL_DIM), jnp.float32),   # torch.zeros(n_features)
    }


if __name__ == "__main__":
    key = jax.random.PRNGKey(0)
    k_x, k_p = jax.random.split(key)
    x = jax.random.normal(k_x, (BATCH, SEQ_LEN, MODEL_DIM), jnp.float32)
    params = init_params(k_p)

    out, p_attn = encoder_layer(x, params)
    out = jax.block_until_ready(out)
    p_attn = jax.block_until_ready(p_attn)

    out_ref, p_ref = encoder_layer_ref(x, params)
    assert out.shape == (BATCH, SEQ_LEN, MODEL_DIM)
    assert p_attn.shape == (BATCH, NUM_HEADS, SEQ_LEN, SEQ_LEN)
    assert jnp.allclose(out, out_ref, atol=2e-2, rtol=2e-2), "output mismatch vs reference"
    assert jnp.allclose(p_attn, p_ref, atol=2e-2, rtol=2e-2), "attn mismatch vs reference"

    print("KERNEL_OK")
</pallas_src>

<mosaic_0001>
module attributes {stable_mosaic.version = 11 : i64} {
  func.func @encoder_layer_kernel(%arg0: memref<16x32xf32, #tpu.memory_space<vmem>>, %arg1: memref<32x224xf32, #tpu.memory_space<vmem>>, %arg2: memref<1x224xf32, #tpu.memory_space<vmem>>, %arg3: memref<128x32xf32, #tpu.memory_space<vmem>>, %arg4: memref<1x32xf32, #tpu.memory_space<vmem>>, %arg5: memref<32x64xf32, #tpu.memory_space<vmem>>, %arg6: memref<1x64xf32, #tpu.memory_space<vmem>>, %arg7: memref<64x32xf32, #tpu.memory_space<vmem>>, %arg8: memref<1x32xf32, #tpu.memory_space<vmem>>, %arg9: memref<1x32xf32, #tpu.memory_space<vmem>>, %arg10: memref<1x32xf32, #tpu.memory_space<vmem>>, %arg11: memref<16x32xf32, #tpu.memory_space<vmem>>, %arg12: memref<16x32xf32, #tpu.memory_space<vmem>>) attributes {dimension_semantics = [], scalar_prefetch = 0 : i64, scratch_operands = 0 : i64, tpu.core_type = #tpu.core_type<tc>} {
    %c0 = arith.constant 0 : index
    %c0_0 = arith.constant 0 : index
    %0 = vector.load %arg0[%c0, %c0_0] : memref<16x32xf32, #tpu.memory_space<vmem>>, vector<16x32xf32>
    %c0_1 = arith.constant 0 : index
    %c0_2 = arith.constant 0 : index
    %1 = vector.load %arg9[%c0_1, %c0_2] : memref<1x32xf32, #tpu.memory_space<vmem>>, vector<1x32xf32>
    %c0_3 = arith.constant 0 : index
    %c0_4 = arith.constant 0 : index
    %2 = vector.load %arg10[%c0_3, %c0_4] : memref<1x32xf32, #tpu.memory_space<vmem>>, vector<1x32xf32>
    %cst = arith.constant dense<0.000000e+00> : vector<16xf32>
    %3 = vector.multi_reduction <add>, %0, %cst [1] : vector<16x32xf32> to vector<16xf32>
    %4 = vector.shape_cast %3 : vector<16xf32> to vector<16x1xf32>
    %cst_5 = arith.constant 3.200000e+01 : f32
    %5 = vector.broadcast %cst_5 : f32 to vector<16x1xf32>
    %6 = arith.divf %4, %5 : vector<16x1xf32>
    %7 = vector.broadcast %6 : vector<16x1xf32> to vector<16x32xf32>
    %8 = arith.subf %0, %7 : vector<16x32xf32>
    %9 = arith.mulf %8, %8 : vector<16x32xf32>
    %cst_6 = arith.constant dense<0.000000e+00> : vector<16xf32>
    %10 = vector.multi_reduction <add>, %9, %cst_6 [1] : vector<16x32xf32> to vector<16xf32>
    %11 = vector.shape_cast %10 : vector<16xf32> to vector<16x1xf32>
    %cst_7 = arith.constant 0.0322580636 : f32
    %12 = vector.broadcast %cst_7 : f32 to vector<16x1xf32>
    %13 = arith.mulf %11, %12 : vector<16x1xf32>
    %14 = math.sqrt %13 : vector<16x1xf32>
    %cst_8 = arith.constant 9.99999997E-7 : f32
    %15 = vector.broadcast %cst_8 : f32 to vector<16x1xf32>
    %16 = arith.addf %14, %15 : vector<16x1xf32>
    %17 = tpu.reciprocal %16 {approx = true} : vector<16x1xf32> -> vector<16x1xf32>
    %18 = vector.broadcast %6 : vector<16x1xf32> to vector<16x32xf32>
    %19 = arith.subf %0, %18 : vector<16x32xf32>
    %20 = vector.broadcast %1 : vector<1x32xf32> to vector<16x32xf32>
    %21 = arith.mulf %20, %19 : vector<16x32xf32>
    %22 = vector.broadcast %17 : vector<16x1xf32> to vector<16x32xf32>
    %23 = arith.mulf %21, %22 : vector<16x32xf32>
    %24 = vector.broadcast %2 : vector<1x32xf32> to vector<16x32xf32>
    %25 = arith.addf %23, %24 : vector<16x32xf32>
    %c0_9 = arith.constant 0 : index
    %c0_10 = arith.constant 0 : index
    %26 = vector.load %arg1[%c0_9, %c0_10] : memref<32x224xf32, #tpu.memory_space<vmem>>, vector<32x224xf32>
    %cst_11 = arith.constant dense<0.000000e+00> : vector<16x224xf32>
    %27 = tpu.matmul %25, %26, %cst_11 {dimension_numbers = #tpu.dot_dimension_numbers<[1], [0], [0], [1], [0, 0, 1, 1], [], []>} : vector<16x32xf32>, vector<32x224xf32>, vector<16x224xf32> -> vector<16x224xf32>
    %c0_12 = arith.constant 0 : index
    %c0_13 = arith.constant 0 : index
    %28 = vector.load %arg2[%c0_12, %c0_13] : memref<1x224xf32, #tpu.memory_space<vmem>>, vector<1x224xf32>
    %29 = vector.broadcast %28 : vector<1x224xf32> to vector<16x224xf32>
    %30 = arith.addf %27, %29 : vector<16x224xf32>
    %c0_14 = arith.constant 0 : index
    %c0_15 = arith.constant 0 : index
    %31 = vector.load %arg3[%c0_14, %c0_15] : memref<128x32xf32, #tpu.memory_space<vmem>>, vector<128x32xf32>
    %32 = vector.extract_strided_slice %30 {offsets = [0, 0], sizes = [8, 224], strides = [1, 1]} : vector<16x224xf32> to vector<8x224xf32>
    %cst_16 = arith.constant 0.000000e+00 : f32
    %33 = vector.broadcast %cst_16 : f32 to vector<8x32xf32>
    %34 = vector.extract_strided_slice %32 {offsets = [0, 0], sizes = [8, 12], strides = [1, 1]} : vector<8x224xf32> to vector<8x12xf32>
    %cst_17 = arith.constant 0.288675129 : f32
    %35 = vector.broadcast %cst_17 : f32 to vector<8x12xf32>
    %36 = arith.mulf %34, %35 : vector<8x12xf32>
    %37 = vector.extract_strided_slice %32 {offsets = [0, 48], sizes = [8, 12], strides = [1, 1]} : vector<8x224xf32> to vector<8x12xf32>
    %38 = vector.extract_strided_slice %32 {offsets = [0, 96], sizes = [8, 32], strides = [1, 1]} : vector<8x224xf32> to vector<8x32xf32>
    %cst_18 = arith.constant dense<0.000000e+00> : vector<8x8xf32>
    %39 = tpu.matmul %36, %37, %cst_18 {dimension_numbers = #tpu.dot_dimension_numbers<[1], [1], [0], [0], [0, 0, 1, 0], [], []>} : vector<8x12xf32>, vector<8x12xf32>, vector<8x8xf32> -> vector<8x8xf32>
    %cst_19 = arith.constant dense<0xFF800000> : vector<8xf32>
    %40 = vector.multi_reduction <maximumf>, %39, %cst_19 [1] : vector<8x8xf32> to vector<8xf32>
    %41 = vector.shape_cast %40 : vector<8xf32> to vector<8x1xf32>
    %42 = vector.broadcast %41 : vector<8x1xf32> to vector<8x8xf32>
    %43 = arith.subf %39, %42 : vector<8x8xf32>
    %44 = math.exp %43 : vector<8x8xf32>
    %cst_20 = arith.constant dense<0.000000e+00> : vector<8xf32>
    %45 = vector.multi_reduction <add>, %44, %cst_20 [1] : vector<8x8xf32> to vector<8xf32>
    %46 = vector.shape_cast %45 : vector<8xf32> to vector<8x1xf32>
    %47 = tpu.reciprocal %46 {approx = true} : vector<8x1xf32> -> vector<8x1xf32>
    %48 = vector.broadcast %47 : vector<8x1xf32> to vector<8x8xf32>
    %49 = arith.mulf %44, %48 : vector<8x8xf32>
    %cst_21 = arith.constant dense<0.000000e+00> : vector<8x32xf32>
    %50 = tpu.matmul %49, %38, %cst_21 {dimension_numbers = #tpu.dot_dimension_numbers<[1], [0], [0], [1], [0, 0, 1, 1], [], []>} : vector<8x8xf32>, vector<8x32xf32>, vector<8x32xf32> -> vector<8x32xf32>
    %51 = vector.extract_strided_slice %31 {offsets = [0, 0], sizes = [32, 32], strides = [1, 1]} : vector<128x32xf32> to vector<32x32xf32>
    %cst_22 = arith.constant dense<0.000000e+00> : vector<8x32xf32>
    %52 = tpu.matmul %50, %51, %cst_22 {dimension_numbers = #tpu.dot_dimension_numbers<[1], [0], [0], [1], [0, 0, 1, 1], [], []>} : vector<8x32xf32>, vector<32x32xf32>, vector<8x32xf32> -> vector<8x32xf32>
    %53 = arith.addf %33, %52 : vector<8x32xf32>
    %54 = vector.extract_strided_slice %32 {offsets = [0, 12], sizes = [8, 12], strides = [1, 1]} : vector<8x224xf32> to vector<8x12xf32>
    %cst_23 = arith.constant 0.288675129 : f32
    %55 = vector.broadcast %cst_23 : f32 to vector<8x12xf32>
    %56 = arith.mulf %54, %55 : vector<8x12xf32>
    %57 = vector.extract_strided_slice %32 {offsets = [0, 60], sizes = [8, 12], strides = [1, 1]} : vector<8x224xf32> to vector<8x12xf32>
    %58 = vector.extract_strided_slice %32 {offsets = [0, 128], sizes = [8, 32], strides = [1, 1]} : vector<8x224xf32> to vector<8x32xf32>
    %cst_24 = arith.constant dense<0.000000e+00> : vector<8x8xf32>
    %59 = tpu.matmul %56, %57, %cst_24 {dimension_numbers = #tpu.dot_dimension_numbers<[1], [1], [0], [0], [0, 0, 1, 0], [], []>} : vector<8x12xf32>, vector<8x12xf32>, vector<8x8xf32> -> vector<8x8xf32>
    %cst_25 = arith.constant dense<0xFF800000> : vector<8xf32>
    %60 = vector.multi_reduction <maximumf>, %59, %cst_25 [1] : vector<8x8xf32> to vector<8xf32>
    %61 = vector.shape_cast %60 : vector<8xf32> to vector<8x1xf32>
    %62 = vector.broadcast %61 : vector<8x1xf32> to vector<8x8xf32>
    %63 = arith.subf %59, %62 : vector<8x8xf32>
    %64 = math.exp %63 : vector<8x8xf32>
    %cst_26 = arith.constant dense<0.000000e+00> : vector<8xf32>
    %65 = vector.multi_reduction <add>, %64, %cst_26 [1] : vector<8x8xf32> to vector<8xf32>
    %66 = vector.shape_cast %65 : vector<8xf32> to vector<8x1xf32>
    %67 = tpu.reciprocal %66 {approx = true} : vector<8x1xf32> -> vector<8x1xf32>
    %68 = vector.broadcast %67 : vector<8x1xf32> to vector<8x8xf32>
    %69 = arith.mulf %64, %68 : vector<8x8xf32>
    %cst_27 = arith.constant dense<0.000000e+00> : vector<8x32xf32>
    %70 = tpu.matmul %69, %58, %cst_27 {dimension_numbers = #tpu.dot_dimension_numbers<[1], [0], [0], [1], [0, 0, 1, 1], [], []>} : vector<8x8xf32>, vector<8x32xf32>, vector<8x32xf32> -> vector<8x32xf32>
    %71 = vector.extract_strided_slice %31 {offsets = [32, 0], sizes = [32, 32], strides = [1, 1]} : vector<128x32xf32> to vector<32x32xf32>
    %cst_28 = arith.constant dense<0.000000e+00> : vector<8x32xf32>
    %72 = tpu.matmul %70, %71, %cst_28 {dimension_numbers = #tpu.dot_dimension_numbers<[1], [0], [0], [1], [0, 0, 1, 1], [], []>} : vector<8x32xf32>, vector<32x32xf32>, vector<8x32xf32> -> vector<8x32xf32>
    %73 = arith.addf %53, %72 : vector<8x32xf32>
    %74 = vector.extract_strided_slice %32 {offsets = [0, 24], sizes = [8, 12], strides = [1, 1]} : vector<8x224xf32> to vector<8x12xf32>
    %cst_29 = arith.constant 0.288675129 : f32
    %75 = vector.broadcast %cst_29 : f32 to vector<8x12xf32>
    %76 = arith.mulf %74, %75 : vector<8x12xf32>
    %77 = vector.extract_strided_slice %32 {offsets = [0, 72], sizes = [8, 12], strides = [1, 1]} : vector<8x224xf32> to vector<8x12xf32>
    %78 = vector.extract_strided_slice %32 {offsets = [0, 160], sizes = [8, 32], strides = [1, 1]} : vector<8x224xf32> to vector<8x32xf32>
    %cst_30 = arith.constant dense<0.000000e+00> : vector<8x8xf32>
    %79 = tpu.matmul %76, %77, %cst_30 {dimension_numbers = #tpu.dot_dimension_numbers<[1], [1], [0], [0], [0, 0, 1, 0], [], []>} : vector<8x12xf32>, vector<8x12xf32>, vector<8x8xf32> -> vector<8x8xf32>
    %cst_31 = arith.constant dense<0xFF800000> : vector<8xf32>
    %80 = vector.multi_reduction <maximumf>, %79, %cst_31 [1] : vector<8x8xf32> to vector<8xf32>
    %81 = vector.shape_cast %80 : vector<8xf32> to vector<8x1xf32>
    %82 = vector.broadcast %81 : vector<8x1xf32> to vector<8x8xf32>
    %83 = arith.subf %79, %82 : vector<8x8xf32>
    %84 = math.exp %83 : vector<8x8xf32>
    %cst_32 = arith.constant dense<0.000000e+00> : vector<8xf32>
    %85 = vector.multi_reduction <add>, %84, %cst_32 [1] : vector<8x8xf32> to vector<8xf32>
    %86 = vector.shape_cast %85 : vector<8xf32> to vector<8x1xf32>
    %87 = tpu.reciprocal %86 {approx = true} : vector<8x1xf32> -> vector<8x1xf32>
    %88 = vector.broadcast %87 : vector<8x1xf32> to vector<8x8xf32>
    %89 = arith.mulf %84, %88 : vector<8x8xf32>
    %cst_33 = arith.constant dense<0.000000e+00> : vector<8x32xf32>
    %90 = tpu.matmul %89, %78, %cst_33 {dimension_numbers = #tpu.dot_dimension_numbers<[1], [0], [0], [1], [0, 0, 1, 1], [], []>} : vector<8x8xf32>, vector<8x32xf32>, vector<8x32xf32> -> vector<8x32xf32>
    %91 = vector.extract_strided_slice %31 {offsets = [64, 0], sizes = [32, 32], strides = [1, 1]} : vector<128x32xf32> to vector<32x32xf32>
    %cst_34 = arith.constant dense<0.000000e+00> : vector<8x32xf32>
    %92 = tpu.matmul %90, %91, %cst_34 {dimension_numbers = #tpu.dot_dimension_numbers<[1], [0], [0], [1], [0, 0, 1, 1], [], []>} : vector<8x32xf32>, vector<32x32xf32>, vector<8x32xf32> -> vector<8x32xf32>
    %93 = arith.addf %73, %92 : vector<8x32xf32>
    %94 = vector.extract_strided_slice %32 {offsets = [0, 36], sizes = [8, 12], strides = [1, 1]} : vector<8x224xf32> to vector<8x12xf32>
    %cst_35 = arith.constant 0.288675129 : f32
    %95 = vector.broadcast %cst_35 : f32 to vector<8x12xf32>
    %96 = arith.mulf %94, %95 : vector<8x12xf32>
    %97 = vector.extract_strided_slice %32 {offsets = [0, 84], sizes = [8, 12], strides = [1, 1]} : vector<8x224xf32> to vector<8x12xf32>
    %98 = vector.extract_strided_slice %32 {offsets = [0, 192], sizes = [8, 32], strides = [1, 1]} : vector<8x224xf32> to vector<8x32xf32>
    %cst_36 = arith.constant dense<0.000000e+00> : vector<8x8xf32>
    %99 = tpu.matmul %96, %97, %cst_36 {dimension_numbers = #tpu.dot_dimension_numbers<[1], [1], [0], [0], [0, 0, 1, 0], [], []>} : vector<8x12xf32>, vector<8x12xf32>, vector<8x8xf32> -> vector<8x8xf32>
    %cst_37 = arith.constant dense<0xFF800000> : vector<8xf32>
    %100 = vector.multi_reduction <maximumf>, %99, %cst_37 [1] : vector<8x8xf32> to vector<8xf32>
    %101 = vector.shape_cast %100 : vector<8xf32> to vector<8x1xf32>
    %102 = vector.broadcast %101 : vector<8x1xf32> to vector<8x8xf32>
    %103 = arith.subf %99, %102 : vector<8x8xf32>
    %104 = math.exp %103 : vector<8x8xf32>
    %cst_38 = arith.constant dense<0.000000e+00> : vector<8xf32>
    %105 = vector.multi_reduction <add>, %104, %cst_38 [1] : vector<8x8xf32> to vector<8xf32>
    %106 = vector.shape_cast %105 : vector<8xf32> to vector<8x1xf32>
    %107 = tpu.reciprocal %106 {approx = true} : vector<8x1xf32> -> vector<8x1xf32>
    %108 = vector.broadcast %107 : vector<8x1xf32> to vector<8x8xf32>
    %109 = arith.mulf %104, %108 : vector<8x8xf32>
    %cst_39 = arith.constant dense<0.000000e+00> : vector<8x32xf32>
    %110 = tpu.matmul %109, %98, %cst_39 {dimension_numbers = #tpu.dot_dimension_numbers<[1], [0], [0], [1], [0, 0, 1, 1], [], []>} : vector<8x8xf32>, vector<8x32xf32>, vector<8x32xf32> -> vector<8x32xf32>
    %111 = vector.extract_strided_slice %31 {offsets = [96, 0], sizes = [32, 32], strides = [1, 1]} : vector<128x32xf32> to vector<32x32xf32>
    %cst_40 = arith.constant dense<0.000000e+00> : vector<8x32xf32>
    %112 = tpu.matmul %110, %111, %cst_40 {dimension_numbers = #tpu.dot_dimension_numbers<[1], [0], [0], [1], [0, 0, 1, 1], [], []>} : vector<8x32xf32>, vector<32x32xf32>, vector<8x32xf32> -> vector<8x32xf32>
    %113 = arith.addf %93, %112 : vector<8x32xf32>
    %114 = tpu.concatenate %49, %69, %89, %109 in 1 : vector<8x8xf32>, vector<8x8xf32>, vector<8x8xf32>, vector<8x8xf32> -> vector<8x32xf32>
    %c0_41 = arith.constant 0 : index
    %c0_42 = arith.constant 0 : index
    %115 = vector.load %arg12[%c0_41, %c0_42] : memref<16x32xf32, #tpu.memory_space<vmem>>, vector<8x32xf32>
    tpu.vector_store %arg12[%c0_41, %c0_42], %114 {strides = array<i32>} : memref<16x32xf32, #tpu.memory_space<vmem>>, vector<8x32xf32>,
    %c0_43 = arith.constant 0 : index
    %c0_44 = arith.constant 0 : index
    %116 = vector.load %arg4[%c0_43, %c0_44] : memref<1x32xf32, #tpu.memory_space<vmem>>, vector<1x32xf32>
    %117 = vector.broadcast %116 : vector<1x32xf32> to vector<8x32xf32>
    %118 = arith.addf %113, %117 : vector<8x32xf32>
    %119 = vector.extract_strided_slice %30 {offsets = [8, 0], sizes = [8, 224], strides = [1, 1]} : vector<16x224xf32> to vector<8x224xf32>
    %cst_45 = arith.constant 0.000000e+00 : f32
    %120 = vector.broadcast %cst_45 : f32 to vector<8x32xf32>
    %121 = vector.extract_strided_slice %119 {offsets = [0, 0], sizes = [8, 12], strides = [1, 1]} : vector<8x224xf32> to vector<8x12xf32>
    %cst_46 = arith.constant 0.288675129 : f32
    %122 = vector.broadcast %cst_46 : f32 to vector<8x12xf32>
    %123 = arith.mulf %121, %122 : vector<8x12xf32>
    %124 = vector.extract_strided_slice %119 {offsets = [0, 48], sizes = [8, 12], strides = [1, 1]} : vector<8x224xf32> to vector<8x12xf32>
    %125 = vector.extract_strided_slice %119 {offsets = [0, 96], sizes = [8, 32], strides = [1, 1]} : vector<8x224xf32> to vector<8x32xf32>
    %cst_47 = arith.constant dense<0.000000e+00> : vector<8x8xf32>
    %126 = tpu.matmul %123, %124, %cst_47 {dimension_numbers = #tpu.dot_dimension_numbers<[1], [1], [0], [0], [0, 0, 1, 0], [], []>} : vector<8x12xf32>, vector<8x12xf32>, vector<8x8xf32> -> vector<8x8xf32>
    %cst_48 = arith.constant dense<0xFF800000> : vector<8xf32>
    %127 = vector.multi_reduction <maximumf>, %126, %cst_48 [1] : vector<8x8xf32> to vector<8xf32>
    %128 = vector.shape_cast %127 : vector<8xf32> to vector<8x1xf32>
    %129 = vector.broadcast %128 : vector<8x1xf32> to vector<8x8xf32>
    %130 = arith.subf %126, %129 : vector<8x8xf32>
    %131 = math.exp %130 : vector<8x8xf32>
    %cst_49 = arith.constant dense<0.000000e+00> : vector<8xf32>
    %132 = vector.multi_reduction <add>, %131, %cst_49 [1] : vector<8x8xf32> to vector<8xf32>
    %133 = vector.shape_cast %132 : vector<8xf32> to vector<8x1xf32>
    %134 = tpu.reciprocal %133 {approx = true} : vector<8x1xf32> -> vector<8x1xf32>
    %135 = vector.broadcast %134 : vector<8x1xf32> to vector<8x8xf32>
    %136 = arith.mulf %131, %135 : vector<8x8xf32>
    %cst_50 = arith.constant dense<0.000000e+00> : vector<8x32xf32>
    %137 = tpu.matmul %136, %125, %cst_50 {dimension_numbers = #tpu.dot_dimension_numbers<[1], [0], [0], [1], [0, 0, 1, 1], [], []>} : vector<8x8xf32>, vector<8x32xf32>, vector<8x32xf32> -> vector<8x32xf32>
    %138 = vector.extract_strided_slice %31 {offsets = [0, 0], sizes = [32, 32], strides = [1, 1]} : vector<128x32xf32> to vector<32x32xf32>
    %cst_51 = arith.constant dense<0.000000e+00> : vector<8x32xf32>
    %139 = tpu.matmul %137, %138, %cst_51 {dimension_numbers = #tpu.dot_dimension_numbers<[1], [0], [0], [1], [0, 0, 1, 1], [], []>} : vector<8x32xf32>, vector<32x32xf32>, vector<8x32xf32> -> vector<8x32xf32>
    %140 = arith.addf %120, %139 : vector<8x32xf32>
    %141 = vector.extract_strided_slice %119 {offsets = [0, 12], sizes = [8, 12], strides = [1, 1]} : vector<8x224xf32> to vector<8x12xf32>
    %cst_52 = arith.constant 0.288675129 : f32
    %142 = vector.broadcast %cst_52 : f32 to vector<8x12xf32>
    %143 = arith.mulf %141, %142 : vector<8x12xf32>
    %144 = vector.extract_strided_slice %119 {offsets = [0, 60], sizes = [8, 12], strides = [1, 1]} : vector<8x224xf32> to vector<8x12xf32>
    %145 = vector.extract_strided_slice %119 {offsets = [0, 128], sizes = [8, 32], strides = [1, 1]} : vector<8x224xf32> to vector<8x32xf32>
    %cst_53 = arith.constant dense<0.000000e+00> : vector<8x8xf32>
    %146 = tpu.matmul %143, %144, %cst_53 {dimension_numbers = #tpu.dot_dimension_numbers<[1], [1], [0], [0], [0, 0, 1, 0], [], []>} : vector<8x12xf32>, vector<8x12xf32>, vector<8x8xf32> -> vector<8x8xf32>
    %cst_54 = arith.constant dense<0xFF800000> : vector<8xf32>
    %147 = vector.multi_reduction <maximumf>, %146, %cst_54 [1] : vector<8x8xf32> to vector<8xf32>
    %148 = vector.shape_cast %147 : vector<8xf32> to vector<8x1xf32>
    %149 = vector.broadcast %148 : vector<8x1xf32> to vector<8x8xf32>
    %150 = arith.subf %146, %149 : vector<8x8xf32>
    %151 = math.exp %150 : vector<8x8xf32>
    %cst_55 = arith.constant dense<0.000000e+00> : vector<8xf32>
    %152 = vector.multi_reduction <add>, %151, %cst_55 [1] : vector<8x8xf32> to vector<8xf32>
    %153 = vector.shape_cast %152 : vector<8xf32> to vector<8x1xf32>
    %154 = tpu.reciprocal %153 {approx = true} : vector<8x1xf32> -> vector<8x1xf32>
    %155 = vector.broadcast %154 : vector<8x1xf32> to vector<8x8xf32>
    %156 = arith.mulf %151, %155 : vector<8x8xf32>
    %cst_56 = arith.constant dense<0.000000e+00> : vector<8x32xf32>
    %157 = tpu.matmul %156, %145, %cst_56 {dimension_numbers = #tpu.dot_dimension_numbers<[1], [0], [0], [1], [0, 0, 1, 1], [], []>} : vector<8x8xf32>, vector<8x32xf32>, vector<8x32xf32> -> vector<8x32xf32>
    %158 = vector.extract_strided_slice %31 {offsets = [32, 0], sizes = [32, 32], strides = [1, 1]} : vector<128x32xf32> to vector<32x32xf32>
    %cst_57 = arith.constant dense<0.000000e+00> : vector<8x32xf32>
    %159 = tpu.matmul %157, %158, %cst_57 {dimension_numbers = #tpu.dot_dimension_numbers<[1], [0], [0], [1], [0, 0, 1, 1], [], []>} : vector<8x32xf32>, vector<32x32xf32>, vector<8x32xf32> -> vector<8x32xf32>
    %160 = arith.addf %140, %159 : vector<8x32xf32>
    %161 = vector.extract_strided_slice %119 {offsets = [0, 24], sizes = [8, 12], strides = [1, 1]} : vector<8x224xf32> to vector<8x12xf32>
    %cst_58 = arith.constant 0.288675129 : f32
    %162 = vector.broadcast %cst_58 : f32 to vector<8x12xf32>
    %163 = arith.mulf %161, %162 : vector<8x12xf32>
    %164 = vector.extract_strided_slice %119 {offsets = [0, 72], sizes = [8, 12], strides = [1, 1]} : vector<8x224xf32> to vector<8x12xf32>
    %165 = vector.extract_strided_slice %119 {offsets = [0, 160], sizes = [8, 32], strides = [1, 1]} : vector<8x224xf32> to vector<8x32xf32>
    %cst_59 = arith.constant dense<0.000000e+00> : vector<8x8xf32>
    %166 = tpu.matmul %163, %164, %cst_59 {dimension_numbers = #tpu.dot_dimension_numbers<[1], [1], [0], [0], [0, 0, 1, 0], [], []>} : vector<8x12xf32>, vector<8x12xf32>, vector<8x8xf32> -> vector<8x8xf32>
    %cst_60 = arith.constant dense<0xFF800000> : vector<8xf32>
    %167 = vector.multi_reduction <maximumf>, %166, %cst_60 [1] : vector<8x8xf32> to vector<8xf32>
    %168 = vector.shape_cast %167 : vector<8xf32> to vector<8x1xf32>
    %169 = vector.broadcast %168 : vector<8x1xf32> to vector<8x8xf32>
    %170 = arith.subf %166, %169 : vector<8x8xf32>
    %171 = math.exp %170 : vector<8x8xf32>
    %cst_61 = arith.constant dense<0.000000e+00> : vector<8xf32>
    %172 = vector.multi_reduction <add>, %171, %cst_61 [1] : vector<8x8xf32> to vector<8xf32>
    %173 = vector.shape_cast %172 : vector<8xf32> to vector<8x1xf32>
    %174 = tpu.reciprocal %173 {approx = true} : vector<8x1xf32> -> vector<8x1xf32>
    %175 = vector.broadcast %174 : vector<8x1xf32> to vector<8x8xf32>
    %176 = arith.mulf %171, %175 : vector<8x8xf32>
    %cst_62 = arith.constant dense<0.000000e+00> : vector<8x32xf32>
    %177 = tpu.matmul %176, %165, %cst_62 {dimension_numbers = #tpu.dot_dimension_numbers<[1], [0], [0], [1], [0, 0, 1, 1], [], []>} : vector<8x8xf32>, vector<8x32xf32>, vector<8x32xf32> -> vector<8x32xf32>
    %178 = vector.extract_strided_slice %31 {offsets = [64, 0], sizes = [32, 32], strides = [1, 1]} : vector<128x32xf32> to vector<32x32xf32>
    %cst_63 = arith.constant dense<0.000000e+00> : vector<8x32xf32>
    %179 = tpu.matmul %177, %178, %cst_63 {dimension_numbers = #tpu.dot_dimension_numbers<[1], [0], [0], [1], [0, 0, 1, 1], [], []>} : vector<8x32xf32>, vector<32x32xf32>, vector<8x32xf32> -> vector<8x32xf32>
    %180 = arith.addf %160, %179 : vector<8x32xf32>
    %181 = vector.extract_strided_slice %119 {offsets = [0, 36], sizes = [8, 12], strides = [1, 1]} : vector<8x224xf32> to vector<8x12xf32>
    %cst_64 = arith.constant 0.288675129 : f32
    %182 = vector.broadcast %cst_64 : f32 to vector<8x12xf32>
    %183 = arith.mulf %181, %182 : vector<8x12xf32>
    %184 = vector.extract_strided_slice %119 {offsets = [0, 84], sizes = [8, 12], strides = [1, 1]} : vector<8x224xf32> to vector<8x12xf32>
    %185 = vector.extract_strided_slice %119 {offsets = [0, 192], sizes = [8, 32], strides = [1, 1]} : vector<8x224xf32> to vector<8x32xf32>
    %cst_65 = arith.constant dense<0.000000e+00> : vector<8x8xf32>
    %186 = tpu.matmul %183, %184, %cst_65 {dimension_numbers = #tpu.dot_dimension_numbers<[1], [1], [0], [0], [0, 0, 1, 0], [], []>} : vector<8x12xf32>, vector<8x12xf32>, vector<8x8xf32> -> vector<8x8xf32>
    %cst_66 = arith.constant dense<0xFF800000> : vector<8xf32>
    %187 = vector.multi_reduction <maximumf>, %186, %cst_66 [1] : vector<8x8xf32> to vector<8xf32>
    %188 = vector.shape_cast %187 : vector<8xf32> to vector<8x1xf32>
    %189 = vector.broadcast %188 : vector<8x1xf32> to vector<8x8xf32>
    %190 = arith.subf %186, %189 : vector<8x8xf32>
    %191 = math.exp %190 : vector<8x8xf32>
    %cst_67 = arith.constant dense<0.000000e+00> : vector<8xf32>
    %192 = vector.multi_reduction <add>, %191, %cst_67 [1] : vector<8x8xf32> to vector<8xf32>
    %193 = vector.shape_cast %192 : vector<8xf32> to vector<8x1xf32>
    %194 = tpu.reciprocal %193 {approx = true} : vector<8x1xf32> -> vector<8x1xf32>
    %195 = vector.broadcast %194 : vector<8x1xf32> to vector<8x8xf32>
    %196 = arith.mulf %191, %195 : vector<8x8xf32>
    %cst_68 = arith.constant dense<0.000000e+00> : vector<8x32xf32>
    %197 = tpu.matmul %196, %185, %cst_68 {dimension_numbers = #tpu.dot_dimension_numbers<[1], [0], [0], [1], [0, 0, 1, 1], [], []>} : vector<8x8xf32>, vector<8x32xf32>, vector<8x32xf32> -> vector<8x32xf32>
    %198 = vector.extract_strided_slice %31 {offsets = [96, 0], sizes = [32, 32], strides = [1, 1]} : vector<128x32xf32> to vector<32x32xf32>
    %cst_69 = arith.constant dense<0.000000e+00> : vector<8x32xf32>
    %199 = tpu.matmul %197, %198, %cst_69 {dimension_numbers = #tpu.dot_dimension_numbers<[1], [0], [0], [1], [0, 0, 1, 1], [], []>} : vector<8x32xf32>, vector<32x32xf32>, vector<8x32xf32> -> vector<8x32xf32>
    %200 = arith.addf %180, %199 : vector<8x32xf32>
    %201 = tpu.concatenate %136, %156, %176, %196 in 1 : vector<8x8xf32>, vector<8x8xf32>, vector<8x8xf32>, vector<8x8xf32> -> vector<8x32xf32>
    %c8 = arith.constant 8 : index
    %c0_70 = arith.constant 0 : index
    %202 = vector.load %arg12[%c8, %c0_70] : memref<16x32xf32, #tpu.memory_space<vmem>>, vector<8x32xf32>
    tpu.vector_store %arg12[%c8, %c0_70], %201 {strides = array<i32>} : memref<16x32xf32, #tpu.memory_space<vmem>>, vector<8x32xf32>,
    %c0_71 = arith.constant 0 : index
    %c0_72 = arith.constant 0 : index
    %203 = vector.load %arg4[%c0_71, %c0_72] : memref<1x32xf32, #tpu.memory_space<vmem>>, vector<1x32xf32>
    %204 = vector.broadcast %203 : vector<1x32xf32> to vector<8x32xf32>
    %205 = arith.addf %200, %204 : vector<8x32xf32>
    %206 = tpu.concatenate %118, %205 in 0 : vector<8x32xf32>, vector<8x32xf32> -> vector<16x32xf32>
    %207 = arith.addf %0, %206 : vector<16x32xf32>
    %cst_73 = arith.constant dense<0.000000e+00> : vector<16xf32>
    %208 = vector.multi_reduction <add>, %207, %cst_73 [1] : vector<16x32xf32> to vector<16xf32>
    %209 = vector.shape_cast %208 : vector<16xf32> to vector<16x1xf32>
    %cst_74 = arith.constant 3.200000e+01 : f32
    %210 = vector.broadcast %cst_74 : f32 to vector<16x1xf32>
    %211 = arith.divf %209, %210 : vector<16x1xf32>
    %212 = vector.broadcast %211 : vector<16x1xf32> to vector<16x32xf32>
    %213 = arith.subf %207, %212 : vector<16x32xf32>
    %214 = arith.mulf %213, %213 : vector<16x32xf32>
    %cst_75 = arith.constant dense<0.000000e+00> : vector<16xf32>
    %215 = vector.multi_reduction <add>, %214, %cst_75 [1] : vector<16x32xf32> to vector<16xf32>
    %216 = vector.shape_cast %215 : vector<16xf32> to vector<16x1xf32>
    %cst_76 = arith.constant 0.0322580636 : f32
    %217 = vector.broadcast %cst_76 : f32 to vector<16x1xf32>
    %218 = arith.mulf %216, %217 : vector<16x1xf32>
    %219 = math.sqrt %218 : vector<16x1xf32>
    %cst_77 = arith.constant 9.99999997E-7 : f32
    %220 = vector.broadcast %cst_77 : f32 to vector<16x1xf32>
    %221 = arith.addf %219, %220 : vector<16x1xf32>
    %222 = tpu.reciprocal %221 {approx = true} : vector<16x1xf32> -> vector<16x1xf32>
    %223 = vector.broadcast %211 : vector<16x1xf32> to vector<16x32xf32>
    %224 = arith.subf %207, %223 : vector<16x32xf32>
    %225 = vector.broadcast %1 : vector<1x32xf32> to vector<16x32xf32>
    %226 = arith.mulf %225, %224 : vector<16x32xf32>
    %227 = vector.broadcast %222 : vector<16x1xf32> to vector<16x32xf32>
    %228 = arith.mulf %226, %227 : vector<16x32xf32>
    %229 = vector.broadcast %2 : vector<1x32xf32> to vector<16x32xf32>
    %230 = arith.addf %228, %229 : vector<16x32xf32>
    %c0_78 = arith.constant 0 : index
    %c0_79 = arith.constant 0 : index
    %231 = vector.load %arg5[%c0_78, %c0_79] : memref<32x64xf32, #tpu.memory_space<vmem>>, vector<32x64xf32>
    %cst_80 = arith.constant dense<0.000000e+00> : vector<16x64xf32>
    %232 = tpu.matmul %230, %231, %cst_80 {dimension_numbers = #tpu.dot_dimension_numbers<[1], [0], [0], [1], [0, 0, 1, 1], [], []>} : vector<16x32xf32>, vector<32x64xf32>, vector<16x64xf32> -> vector<16x64xf32>
    %c0_81 = arith.constant 0 : index
    %c0_82 = arith.constant 0 : index
    %233 = vector.load %arg6[%c0_81, %c0_82] : memref<1x64xf32, #tpu.memory_space<vmem>>, vector<1x64xf32>
    %234 = vector.broadcast %233 : vector<1x64xf32> to vector<16x64xf32>
    %235 = arith.addf %232, %234 : vector<16x64xf32>
    %cst_83 = arith.constant 0.000000e+00 : f32
    %236 = vector.broadcast %cst_83 : f32 to vector<16x64xf32>
    %237 = arith.maximumf %235, %236 : vector<16x64xf32>
    %c0_84 = arith.constant 0 : index
    %c0_85 = arith.constant 0 : index
    %238 = vector.load %arg7[%c0_84, %c0_85] : memref<64x32xf32, #tpu.memory_space<vmem>>, vector<64x32xf32>
    %cst_86 = arith.constant dense<0.000000e+00> : vector<16x32xf32>
    %239 = tpu.matmul %237, %238, %cst_86 {dimension_numbers = #tpu.dot_dimension_numbers<[1], [0], [0], [1], [0, 0, 1, 1], [], []>} : vector<16x64xf32>, vector<64x32xf32>, vector<16x32xf32> -> vector<16x32xf32>
    %c0_87 = arith.constant 0 : index
    %c0_88 = arith.constant 0 : index
    %240 = vector.load %arg8[%c0_87, %c0_88] : memref<1x32xf32, #tpu.memory_space<vmem>>, vector<1x32xf32>
    %241 = vector.broadcast %240 : vector<1x32xf32> to vector<16x32xf32>
    %242 = arith.addf %239, %241 : vector<16x32xf32>
    %243 = arith.addf %207, %242 : vector<16x32xf32>
    %c0_89 = arith.constant 0 : index
    %c0_90 = arith.constant 0 : index
    %244 = vector.load %arg11[%c0_89, %c0_90] : memref<16x32xf32, #tpu.memory_space<vmem>>, vector<16x32xf32>
    tpu.vector_store %arg11[%c0_89, %c0_90], %243 {strides = array<i32>} : memref<16x32xf32, #tpu.memory_space<vmem>>, vector<16x32xf32>,
    return
  }
}

</mosaic_0001>

<bundles_post_ra>
// kernel: encoder_layer.1
= control target key start
LH: loop header
LB: loop body
LE: loop exit
PB: predicated region body
PF: predicated region fallthrough
CT: control target
= control target key end

     0   :  { %vm45_vm0 = vcmask 261120   ;;  %s3481_s0 = inlined_call_operand.vmem [shape: f32[16,32], index: 0, kind: input, shape index: {}]   ;;  %s3482_s1 = inlined_call_operand.vmem [shape: f32[32,224], index: 1, kind: input, shape index: {}]   ;;  %s3483_s2 = inlined_call_operand.vmem [shape: f32[1,224], index: 2, kind: input, shape index: {}]   ;;  %s3484_s3 = inlined_call_operand.vmem [shape: f32[128,32], index: 3, kind: input, shape index: {}]   ;;  %s3485_s4 = inlined_call_operand.vmem [shape: f32[1,32], index: 4, kind: input, shape index: {}]   ;;  %s3486_s5 = inlined_call_operand.vmem [shape: f32[32,64], index: 5, kind: input, shape index: {}]   ;;  %s3487_s6 = inlined_call_operand.vmem [shape: f32[1,64], index: 6, kind: input, shape index: {}]   ;;  %s3488_s7 = inlined_call_operand.vmem [shape: f32[64,32], index: 7, kind: input, shape index: {}]   ;;  %s3489_s8 = inlined_call_operand.vmem [shape: f32[1,32], index: 8, kind: input, shape index: {}]   ;;  %s3490_s9 = inlined_call_operand.vmem [shape: f32[1,32], index: 9, kind: input, shape index: {}]   ;;  %s3491_s10 = inlined_call_operand.vmem [shape: f32[1,32], index: 10, kind: input, shape index: {}]   ;;  %s3492_s11 = inlined_call_operand.hbm [shape: f32[16,32], index: 11, kind: output, shape index: {0}]   ;;  %s3493_s12 = inlined_call_operand.vmem [shape: f32[16,32], index: 12, kind: output, shape index: {1}]  }
   0x1   :  { %v3021_v0 = vld [vmem:[%s3481_s0] sm:$0xff] }
   0x2   :  { %18 = vsyncpa [#allocation3], 0  ;;  %v46_v1 = vsel %vm45_vm0, %v3021_v0, 0.0  ;;  %v3028_v2 = vld [vmem:[%s3481_s0 + $0x8] sm:$0xff]  ;;  %v106_v15 = vld [vmem:[%s3482_s1 + $0x18] sm:$0xff]  ;;  %v2935_v21 = vmov 0.0   ;;  %v113_v53 = vlaneseq }
   0x3   :  { %47 = vadd.xlane.f32.xlu0 %v46_v1  ;;  %v49_v3 = vsel %vm45_vm0, %v3028_v2, 0.0  ;;  %v104_v14 = vld [vmem:[%s3482_s1 + $0x8] sm:$0xff]  ;;  %v103_v16 = vld [vmem:[%s3482_s1] sm:$0xff]  ;;  %v105_v18 = vld [vmem:[%s3482_s1 + $0x10] sm:$0xff]  ;;  %193 = vmatprep.mubr.f32.mxu0 %v2935_v21  ;;  %vm2936_vm5 = vmmov 0   ;;  %s2937_s0 = smov 80  }
   0x4   :  { %50 = vadd.xlane.f32.xlu1 %v49_v3  ;;  %v2765_v17 = vpack.c.bf16 %v106_v15, %v104_v14  ;;  %v108_v19 = vld [vmem:[%s3482_s1 + $0x28] sm:$0xff]  ;;  %v110_v20 = vld [vmem:[%s3482_s1 + $0x38] sm:$0xff]  ;;  %2572 = vmatprep.subr.mxu1 %v2935_v21  ;;  %v2767_v22 = vpack.c.bf16 %v105_v18, %v103_v16  ;;  %v107_v24 = vld [vmem:[%s3482_s1 + $0x20] sm:$0xff]  ;;  %v114_v54 = vshrl.u32 %v113_v53, 7  ;;  %s2938_s25 = smov 68   ;;  %vm226_vm6 = vcmask 97280  }
   0x5   :  { %v2769_v23 = vpack.c.bf16 %v110_v20, %v108_v19  ;;  %v109_v25 = vld [vmem:[%s3482_s1 + $0x30] sm:$0xff]  ;;  %v3066_v35 = vld [vmem:[%s3490_s9] ss:$0 sm:$0xff]  ;;  %2574 = vmatprep.mubr.msk.f32.mxu1 %vm2936_vm5, %v2935_v21  ;;  %vm302_vm7 = vcmask 64512   ;;  %s2940_s26 = smov 116   ;;  %s2941_s27 = smov 56  }
   0x6   :  { %2766 = vmatprep.subr.bf16.mxu0 %v2765_v17  ;;  %v2771_v26 = vpack.c.bf16 %v109_v25, %v107_v24  ;;  %v3072_v40 = vld [vmem:[%s3491_s10] ss:$0 sm:$0xff]  ;;  %v115_v55 = vsub.s32 0, %v114_v54  ;;  %v119_v61 = vsub.s32 1, %v114_v54  ;;  %s2942_s28 = smov 104   ;;  %s2944_s10 = smov 96  }
   0x7   :  { %2768 = vmatpush1.bf16.msra.mxu0 %v2767_v22  ;;  %v111_v56 = vld [vmem:[%s3483_s2] sm:$0x3]  ;;  %s2939_s2 = smov 32   ;;  %s2945_s29 = smov 92   ;;  %vm1189_vm10 = vcmask 195584   ;;  %vm1187_vm11 = vcmask 130048  }
   0x8   :  { %2770 = vmatprep.subr.bf16.mxu0 %v2769_v23  ;;  %v116_v57 = vrot.slane %v111_v56, %v115_v55  ;;  %v120_v62 = vrot.slane %v111_v56, %v119_v61  ;;  %s2946_s30 = smov 44   ;;  %s2947_s21 = smov 64   ;;  %vm2329_vm14 = vcmask 523264  }
   0xb   :  { %2772 = vmatpush1.bf16.msra.mxu0 %v2771_v26 }
   0xc   :  { %2567 = vmatprep.subr.mxu0 %v2935_v21 }
  0x90   :  { %v48_v4 = vpop.xlane.xlu0 %47 }
  0x91   :  { %v53_v5 = vmul.f32 0.03125, %v48_v4  ;;  %v51_v9 = vpop.xlane.xlu1 %50 }
  0x92   :  { %v54_v10 = vmul.f32 0.03125, %v51_v9 }
  0x93   :  { %v55_v6 = vsub.f32 %v3021_v0, %v53_v5 }
  0x94   :  { %v56_v11 = vsub.f32 %v3028_v2, %v54_v10 }
  0x95   :  { %v57_v7 = vmul.f32 %v55_v6, %v55_v6  ;;  %v91_v38 = vmul.f32 %v3066_v35, %v55_v6 }
  0x96   :  { %v58_v12 = vmul.f32 %v56_v11, %v56_v11  ;;  %v92_v49 = vmul.f32 %v3066_v35, %v56_v11 }
  0x97   :  { %v59_v8 = vsel %vm45_vm0, %v57_v7, 0.0 }
  0x98   :  { %60 = vadd.xlane.f32.xlu0 %v59_v8  ;;  %v62_v13 = vsel %vm45_vm0, %v58_v12, 0.0 }
  0x99   :  { %63 = vadd.xlane.f32.xlu1 %v62_v13 }
 0x125   :  { %v61_v27 = vpop.xlane.xlu0 %60 }
 0x126   :  { %v65_v28 = vmul.f32 0.032258064, %v61_v27  ;;  %v64_v36 = vpop.xlane.xlu1 %63 }
 0x127   :  { %v66_v37 = vmul.f32 0.032258064, %v64_v36  ;;  %v211_v36 = vld [vmem:[%s3484_s3 + $0x28] sm:$0xff] }
 0x128   :  { %2863 = vrsqrt.f32 %v65_v28  ;;  %vm69_vm1 = vcmp.eq.f32.partialorder %v65_v28, inf  ;;  %v72_v31 = vand.u32 2147483648, %v65_v28  ;;  %vm71_vm2 = vcmp.eq.f32.partialorder %v65_v28, 0.0 }
 0x129   :  { %vm76_vm3 = vcmp.eq.f32.partialorder %v66_v37, inf  ;;  %v79_v44 = vand.u32 2147483648, %v66_v37  ;;  %vm78_vm4 = vcmp.eq.f32.partialorder %v66_v37, 0.0 }
 0x132   :  { %v2864_v29 = vpop.eup %2863 }
 0x133   :  { %v68_v30 = vmul.f32 %v2864_v29, %v65_v28 }
 0x135   :  { %v70_v32 = vsel %vm69_vm1, %v65_v28, %v68_v30 }
 0x136   :  { %v73_v33 = vsel %vm71_vm2, %v72_v31, %v70_v32 }
 0x137   :  { %v81_v34 = vadd.f32 1e-06, %v73_v33  ;;  %v2943_v33 = vmov 0.0|0.0  }
 0x139   :  { %2865 = vrcp.f32 %v81_v34  ;;  %v210_v34 = vld [vmem:[%s3484_s3 + $0x20] sm:$0xff] }
 0x13a   :  { %2867 = vrsqrt.f32 %v66_v37 }
 0x143   :  { %v2866_v39 = vpop.eup %2865 }
 0x144   :  { %v93_v41 = vmul.f32 %v2866_v39, %v91_v38  ;;  %v2868_v43 = vpop.eup %2867  ;;  %v3143_v38 = vpack.c.bf16 %v211_v36, %v210_v34  ;;  %v213_v39 = vld [vmem:[%s3484_s3 + $0x38] sm:$0xff]  ;;  %v218_v36 = vld [vmem:[%s3484_s3 + $0x60] sm:$0xff] }
 0x145   :  { %v75_v45 = vmul.f32 %v2868_v43, %v66_v37  ;;  %v206_v43 = vld [vmem:[%s3484_s3] sm:$0xff] }
 0x146   :  { %v101_v42 = vadd.f32 %v3072_v40, %v93_v41 }
 0x147   :  { %v77_v46 = vsel %vm76_vm3, %v66_v37, %v75_v45  ;;  %v212_v37 = vld [vmem:[%s3484_s3 + $0x30] sm:$0xff] }
 0x148   :  { %2437 = vmatmul.mubr.msk.f32.vlgmr.msra.gmra.mrb[0].mxu0 %vm45_vm0, %v101_v42  ;;  %v80_v47 = vsel %vm78_vm4, %v79_v44, %v77_v46  ;;  %v3149_v41 = vpack.c.bf16 %v213_v39, %v212_v37  ;;  %v207_v44 = vld [vmem:[%s3484_s3 + $0x8] sm:$0xff]  ;;  %v220_v39 = vld [vmem:[%s3484_s3 + $0x70] sm:$0xff] }
 0x149   :  { %199 = vmatprep.mubr.f32.mxu0 %v2935_v21  ;;  %v82_v48 = vadd.f32 1e-06, %v80_v47  ;;  %v3160_v46 = vpack.c.bf16 %v207_v44, %v206_v43  ;;  %v219_v37 = vld [vmem:[%s3484_s3 + $0x68] sm:$0xff] }
 0x14b   :  { %2869 = vrcp.f32 %v82_v48  ;;  %v208_v48 = vld [vmem:[%s3484_s3 + $0x10] sm:$0xff] }
 0x155   :  { %v2870_v50 = vpop.eup %2869 }
 0x156   :  { %v94_v51 = vmul.f32 %v2870_v50, %v92_v49  ;;  %v209_v49 = vld [vmem:[%s3484_s3 + $0x18] sm:$0xff] }
 0x157   :  { %v3173_v50 = vpack.c.bf16 %v209_v49, %v208_v48 }
 0x158   :  { %v102_v52 = vadd.f32 %v3072_v40, %v94_v51 }
 0x15a   :  { %2438 = vmatmul.mubr.msk.f32.gmra.mrb[2].mxu0 %vm45_vm0, %v102_v52 }
 0x15b   :  { %2569 = vmatprep.mubr.msk.f32.mxu0 %vm2936_vm5, %v2935_v21 }
 0x21b   :  { %v195_v58 = vpop.f32.mrb[0].mxu0 }
 0x21c   :  { %v3087_v59 = vadd.f32 %v195_v58, %v116_v57  ;;  %v197_v60 = vpop.f32.mrb[1].mxu0 }
 0x21d   :  { %v3102_v7 = vadd.f32 %v197_v60, %v120_v62 }
 0x21e   :  { %224 = vrot.lane.b32.xlu0 %v3087_v59, %s2937_s0  ;;  %v3100_v6 = vmul.f32 0.28867513, %v3087_v59 }
 0x222   :  { %392 = vrot.lane.b32.xlu0 %v3087_v59, %s2938_s25 }
 0x22d   :  { %v201_v63 = vpop.f32.mrb[2].mxu0 }
 0x22e   :  { %v3093_v1 = vadd.f32 %v201_v63, %v116_v57  ;;  %v203_v3 = vpop.f32.mrb[3].mxu0 }
 0x22f   :  { %v3095_v4 = vadd.f32 %v203_v3, %v120_v62 }
 0x230   :  { %v3245_v34 = vmul.f32 0.28867513, %v3093_v1 }
 0x290   :  { %v225_v5 = vpop.permute.xlu0 %224 }
 0x291   :  { %2568 = vmatpush3.xpose.msk.msra.mxu0 %vm226_vm6, %v225_v5 }
 0x292   :  { %2582 = vmatprep.subr.mxu0 %v2935_v21 }
 0x294   :  { %2570 = vmatmul.mubr.msk.f32.vlgmr.msra.gmra.mrb[4].mxu0 %vm226_vm6, %v3100_v6  ;;  %v393_v20 = vpop.permute.xlu0 %392 }
 0x295   :  { %2583 = vmatpush3.msra.mxu0 %v3102_v7  ;;  %2584 = vmatprep.mubr.msk.f32.mxu0 %vm2936_vm5, %v2935_v21 }
 0x296   :  { %2779 = vmatprep.subr.bf16.mxu0 %v2943_v33 }
 0x367   :  { %v298_v8 = vpop.f32.mrb[4].mxu0 }
 0x368   :  { %v2571_v9 = vpop.f32.mrb[5].mxu0  ;;  %v303_v10 = vsel %vm302_vm7, %v298_v8, -inf }
 0x369   :  { %304 = vmax.xlane.f32.xlu1 %v303_v10 }
 0x37a   :  { %314 = vrot.lane.b32.xlu1 %v3087_v59, %s2939_s2 }
 0x3f6   :  { %v305_v11 = vpop.xlane.xlu1 %304 }
 0x3f7   :  { %v306_v12 = vsub.f32 %v298_v8, %v305_v11 }
 0x3f9   :  { %v307_v13 = vmul.f32 1.442695, %v306_v12  ;;  %v215_v12 = vld [vmem:[%s3484_s3 + $0x48] sm:$0xff] }
 0x3fa   :  { %v315_v14 = vpop.permute.xlu1 %314 }
 0x3fb   :  { %2871 = vpow2.f32 %v307_v13  ;;  %2573 = vmatpush3.msra.mxu1 %v315_v14  ;;  %v216_v13 = vld [vmem:[%s3484_s3 + $0x50] sm:$0xff] }
 0x3fc   :  { %2577 = vmatprep.subr.mxu1 %v2935_v21 }
 0x405   :  { %v2872_v15 = vpop.eup %2871 }
 0x406   :  { %v309_v16 = vsel %vm302_vm7, %v2872_v15, 0.0 }
 0x407   :  { %310 = vadd.xlane.f32.xlu1 %v309_v16 }
 0x418   :  { %390 = vrot.lane.b32.xlu1 %v3100_v6, %s2940_s26 }
 0x494   :  { %v311_v17 = vpop.xlane.xlu1 %310 }
 0x495   :  { %2873 = vrcp.f32 %v311_v17 }
 0x498   :  { %v391_v22 = vpop.permute.xlu1 %390 }
 0x49f   :  { %v2874_v18 = vpop.eup %2873 }
 0x4a0   :  { %v3116_v19 = vmul.f32 %v2874_v18, %v2872_v15  ;;  %v217_v15 = vld [vmem:[%s3484_s3 + $0x58] sm:$0xff] }
 0x4a2   :  { %2575 = vmatmul.mubr.msk.f32.vlgmr.msra.gmra.mrb[0].mxu1 %vm302_vm7, %v3116_v19 }
 0x4a3   :  { %2578 = vmatpush3.xpose.msk.msra.mxu1 %vm226_vm6, %v393_v20  ;;  %2579 = vmatprep.mubr.msk.f32.mxu1 %vm2936_vm5, %v2935_v21 }
 0x4a4   :  { %2773 = vmatprep.subr.bf16.mxu1 %v2943_v33 }
 0x4a6   :  { %2580 = vmatmul.mubr.msk.f32.vlgmr.msra.gmra.mrb[2].mxu1 %vm226_vm6, %v391_v22 }
 0x4a7   :  { %2595 = vmatprep.mubr.msk.f32.mxu1 %vm2936_vm5, %v2935_v21  ;;  %2775 = vmatpush3.bf16.msra.mxu1 %v3143_v38 }
 0x4a8   :  { %2776 = vmatprep.subr.bf16.mxu1 %v2943_v33 }
 0x4ab   :  { %2778 = vmatpush3.bf16.msra.mxu1 %v3149_v41 }
 0x4ac   :  { %2609 = vmatprep.subr.mxu1 %v2935_v21 }
 0x575   :  { %v386_v23 = vpop.f32.mrb[0].mxu1 }
 0x576   :  { %v2576_v24 = vpop.f32.mrb[1].mxu1 }
 0x579   :  { %v464_v25 = vpop.f32.mrb[2].mxu1 }
 0x57a   :  { %v2581_v26 = vpop.f32.mrb[3].mxu1  ;;  %v468_v27 = vsel %vm302_vm7, %v464_v25, -inf }
 0x57b   :  { %469 = vmax.xlane.f32.xlu0 %v468_v27 }
 0x591   :  { %700 = vrot.lane.b32.xlu0 %v3087_v59, %s2941_s27 }
 0x608   :  { %v470_v28 = vpop.xlane.xlu0 %469 }
 0x609   :  { %v471_v29 = vsub.f32 %v464_v25, %v470_v28 }
 0x60b   :  { %v472_v30 = vmul.f32 1.442695, %v471_v29 }
 0x60c   :  { %v701_v52 = vpop.permute.xlu0 %700 }
 0x60d   :  { %2875 = vpow2.f32 %v472_v30 }
 0x617   :  { %v2876_v31 = vpop.eup %2875 }
 0x618   :  { %v474_v32 = vsel %vm302_vm7, %v2876_v31, 0.0 }
 0x619   :  { %475 = vadd.xlane.f32.xlu1 %v474_v32 }
 0x62a   :  { %698 = vrot.lane.b32.xlu1 %v3100_v6, %s2942_s28 }
 0x6a6   :  { %v476_v42 = vpop.xlane.xlu1 %475 }
 0x6a7   :  { %2877 = vrcp.f32 %v476_v42  ;;  %v3258_v42 = vpack.c.bf16 %v219_v37, %v218_v36 }
 0x6aa   :  { %v699_v54 = vpop.permute.xlu1 %698 }
 0x6b1   :  { %v2878_v45 = vpop.eup %2877 }
 0x6b2   :  { %v3162_v47 = vmul.f32 %v2878_v45, %v2876_v31 }
 0x6b4   :  { %2585 = vmatmul.mubr.msk.f32.vlgmr.msra.gmra.mrb[6].mxu0 %vm302_vm7, %v3162_v47 }
 0x6b5   :  { %2781 = vmatpush3.bf16.msra.mxu0 %v3160_v46  ;;  %2606 = vmatprep.mubr.msk.f32.mxu0 %vm2936_vm5, %v2935_v21 }
 0x6b6   :  { %2782 = vmatprep.subr.bf16.mxu0 %v2943_v33 }
 0x6b9   :  { %2784 = vmatpush3.bf16.msra.mxu0 %v3173_v50 }
 0x6ba   :  { %2614 = vmatprep.subr.mxu0 %v2935_v21 }
 0x6bc   :  { %2607 = vmatmul.mubr.msk.f32.vlgmr.msra.gmra.mrb[8].mxu0 %vm45_vm0, %v386_v23 }
 0x6bd   :  { %2616 = vmatprep.mubr.msk.f32.mxu0 %vm2936_vm5, %v2935_v21 }
 0x787   :  { %v548_v51 = vpop.f32.mrb[6].mxu0 }
 0x788   :  { %v2586_v53 = vpop.f32.mrb[7].mxu0  ;;  %2596 = vmatmul.mubr.msk.f32.vlgmr.msra.gmra.mrb[4].mxu1 %vm45_vm0, %v548_v51 }
 0x789   :  { %2610 = vmatpush3.xpose.msk.msra.mxu1 %vm226_vm6, %v701_v52  ;;  %2611 = vmatprep.mubr.msk.f32.mxu1 %vm2936_vm5, %v2935_v21 }
 0x78a   :  { %2785 = vmatprep.subr.bf16.mxu1 %v2943_v33 }
 0x78c   :  { %2612 = vmatmul.mubr.msk.f32.vlgmr.msra.gmra.mrb[6].mxu1 %vm226_vm6, %v699_v54 }
 0x78d   :  { %2627 = vmatprep.mubr.msk.f32.mxu1 %vm2936_vm5, %v2935_v21 }
 0x78f   :  { %v694_v55 = vpop.f32.mrb[8].mxu0 }
 0x790   :  { %v2608_v56 = vpop.f32.mrb[9].mxu0 }
 0x85b   :  { %v621_v57 = vpop.f32.mrb[4].mxu1 }
 0x85c   :  { %v3191_v58 = vadd.f32 %v694_v55, %v621_v57  ;;  %v2597_v60 = vpop.f32.mrb[5].mxu1 }
 0x85f   :  { %v772_v61 = vpop.f32.mrb[6].mxu1 }
 0x860   :  { %v2613_v62 = vpop.f32.mrb[7].mxu1  ;;  %v776_v63 = vsel %vm302_vm7, %v772_v61, -inf }
 0x861   :  { %777 = vmax.xlane.f32.xlu0 %v776_v63 }
 0x877   :  { %788 = vrot.lane.b32.xlu0 %v3102_v7, %s2944_s10 }
 0x87b   :  { %938 = vrot.lane.b32.xlu0 %v3100_v6, %s2945_s29  ;;  %v214_v6 = vld [vmem:[%s3484_s3 + $0x40] sm:$0xff] }
 0x87c   :  { %v3211_v14 = vpack.c.bf16 %v215_v12, %v214_v6 }
 0x87e   :  { %2787 = vmatpush3.bf16.msra.mxu1 %v3211_v14 }
 0x87f   :  { %2788 = vmatprep.subr.bf16.mxu1 %v2943_v33 }
 0x8ee   :  { %v778_v3 = vpop.xlane.xlu0 %777 }
 0x8ef   :  { %v779_v5 = vsub.f32 %v772_v61, %v778_v3 }
 0x8f1   :  { %v780_v8 = vmul.f32 1.442695, %v779_v5 }
 0x8f2   :  { %v789_v9 = vpop.permute.xlu0 %788 }
 0x8f3   :  { %2879 = vpow2.f32 %v780_v8  ;;  %2615 = vmatpush3.msra.mxu0 %v789_v9 }
 0x8f4   :  { %2630 = vmatprep.subr.mxu0 %v2935_v21 }
 0x8f6   :  { %v939_v22 = vpop.permute.xlu0 %938 }
 0x8fd   :  { %v2880_v10 = vpop.eup %2879 }
 0x8fe   :  { %v782_v11 = vsel %vm302_vm7, %v2880_v10, 0.0 }
 0x8ff   :  { %783 = vadd.xlane.f32.xlu1 %v782_v11 }
 0x910   :  { %940 = vrot.lane.b32.xlu1 %v3087_v59, %s2946_s30  ;;  %v3217_v59 = vpack.c.bf16 %v217_v15, %v216_v13 }
 0x912   :  { %2790 = vmatpush3.bf16.msra.mxu1 %v3217_v59 }
 0x913   :  { %2791 = vmatprep.subr.bf16.mxu1 %v2943_v33 }
 0x98c   :  { %v784_v16 = vpop.xlane.xlu1 %783 }
 0x98d   :  { %2881 = vrcp.f32 %v784_v16 }
 0x990   :  { %v941_v20 = vpop.permute.xlu1 %940 }
 0x997   :  { %v2882_v17 = vpop.eup %2881 }
 0x998   :  { %v3222_v18 = vmul.f32 %v2882_v17, %v2880_v10 }
 0x99a   :  { %2617 = vmatmul.mubr.msk.f32.vlgmr.msra.gmra.mrb[10].mxu0 %vm302_vm7, %v3222_v18 }
 0x99b   :  { %2631 = vmatpush3.xpose.msk.msra.mxu0 %vm226_vm6, %v941_v20  ;;  %2632 = vmatprep.mubr.msk.f32.mxu0 %vm2936_vm5, %v2935_v21 }
 0x99c   :  { %2635 = vmatprep.subr.mxu0 %v2935_v21 }
 0x99e   :  { %2633 = vmatmul.mubr.msk.f32.vlgmr.msra.gmra.mrb[12].mxu0 %vm226_vm6, %v939_v22 }
 0x99f   :  { %2637 = vmatprep.mubr.msk.f32.mxu0 %vm2936_vm5, %v2935_v21 }
 0xa6d   :  { %v860_v23 = vpop.f32.mrb[10].mxu0 }
 0xa6e   :  { %v2618_v24 = vpop.f32.mrb[11].mxu0  ;;  %2628 = vmatmul.mubr.msk.f32.vlgmr.msra.gmra.mrb[8].mxu1 %vm45_vm0, %v860_v23 }
 0xa6f   :  { %2648 = vmatprep.mubr.msk.f32.mxu1 %vm2936_vm5, %v2935_v21  ;;  %2793 = vmatpush3.bf16.msra.mxu1 %v3258_v42 }
 0xa70   :  { %2794 = vmatprep.subr.bf16.mxu1 %v2943_v33 }
 0xa71   :  { %v1012_v25 = vpop.f32.mrb[12].mxu0 }
 0xa72   :  { %v2634_v26 = vpop.f32.mrb[13].mxu0  ;;  %v1016_v27 = vsel %vm302_vm7, %v1012_v25, -inf }
 0xa73   :  { %1017 = vmax.xlane.f32.xlu1 %v1016_v27 }
 0xa84   :  { %1202 = vrot.lane.b32.xlu1 %v3093_v1, %s2937_s0 }
 0xa88   :  { %1368 = vrot.lane.b32.xlu1 %v3093_v1, %s2938_s25 }
 0xb00   :  { %v1018_v28 = vpop.xlane.xlu1 %1017 }
 0xb01   :  { %v1019_v29 = vsub.f32 %v1012_v25, %v1018_v28 }
 0xb03   :  { %v1020_v30 = vmul.f32 1.442695, %v1019_v29 }
 0xb04   :  { %v1203_v54 = vpop.permute.xlu1 %1202 }
 0xb05   :  { %2883 = vpow2.f32 %v1020_v30 }
 0xb08   :  { %v1369_v56 = vpop.permute.xlu1 %1368 }
 0xb0f   :  { %v2884_v31 = vpop.eup %2883 }
 0xb10   :  { %v1022_v32 = vsel %vm302_vm7, %v2884_v31, 0.0 }
 0xb11   :  { %1023 = vadd.xlane.f32.xlu0 %v1022_v32 }
 0xb27   :  { %1027 = vrot.lane.b32.xlu0 %v3102_v7, %s2947_s21  ;;  %v221_v7 = vld [vmem:[%s3484_s3 + $0x78] sm:$0xff] }
 0xb28   :  { %v3264_v43 = vpack.c.bf16 %v221_v7, %v220_v39 }
 0xb2a   :  { %2796 = vmatpush3.bf16.msra.mxu1 %v3264_v43 }
 0xb2b   :  { %1366 = vrot.lane.b32.xlu0 %v3245_v34, %s2940_s26  ;;  %2661 = vmatprep.subr.mxu1 %v2935_v21  ;;  %s2949_s26 = smov 16  }
 0xb41   :  { %v933_v44 = vpop.f32.mrb[8].mxu1 }
 0xb42   :  { %v937_v45 = vadd.f32 %v933_v44, %v3191_v58  ;;  %v2629_v48 = vpop.f32.mrb[9].mxu1 }
 0xb9e   :  { %v1024_v49 = vpop.xlane.xlu0 %1023 }
 0xb9f   :  { %2885 = vrcp.f32 %v1024_v49 }
 0xba2   :  { %v1028_v51 = vpop.permute.xlu0 %1027 }
 0xba3   :  { %2636 = vmatpush3.msra.mxu0 %v1028_v51 }
 0xba4   :  { %2651 = vmatprep.subr.mxu0 %v2935_v21 }
 0xba6   :  { %v1367_v58 = vpop.permute.xlu0 %1366 }
 0xba9   :  { %v2886_v52 = vpop.eup %2885 }
 0xbaa   :  { %v3271_v53 = vmul.f32 %v2886_v52, %v2884_v31 }
 0xbac   :  { %2638 = vmatmul.mubr.msk.f32.vlgmr.msra.gmra.mrb[14].mxu0 %vm302_vm7, %v3271_v53 }
 0xbad   :  { %2652 = vmatpush3.xpose.msk.msra.mxu0 %vm226_vm6, %v1203_v54  ;;  %2653 = vmatprep.mubr.msk.f32.mxu0 %vm2936_vm5, %v2935_v21 }
 0xbae   :  { %2656 = vmatprep.subr.mxu0 %v2935_v21 }
 0xbb0   :  { %2654 = vmatmul.mubr.msk.f32.vlgmr.msra.gmra.mrb[16].mxu0 %vm226_vm6, %v3245_v34 }
 0xbb1   :  { %2658 = vmatprep.mubr.msk.f32.mxu0 %vm2936_vm5, %v2935_v21 }
 0xc7f   :  { %v1099_v55 = vpop.f32.mrb[14].mxu0 }
 0xc80   :  { %v2639_v57 = vpop.f32.mrb[15].mxu0  ;;  %2649 = vmatmul.mubr.msk.f32.vlgmr.msra.gmra.mrb[10].mxu1 %vm45_vm0, %v1099_v55 }
 0xc81   :  { %2662 = vmatpush3.xpose.msk.msra.mxu1 %vm226_vm6, %v1369_v56  ;;  %2663 = vmatprep.mubr.msk.f32.mxu1 %vm2936_vm5, %v2935_v21 }
 0xc82   :  { %2797 = vmatprep.subr.bf16.mxu1 %v2943_v33 }
 0xc83   :  { %v1275_v60 = vpop.f32.mrb[16].mxu0 }
 0xc84   :  { %v2655_v61 = vpop.f32.mrb[17].mxu0  ;;  %2664 = vmatmul.mubr.msk.f32.vlgmr.msra.gmra.mrb[12].mxu1 %vm226_vm6, %v1367_v58  ;;  %v1279_v62 = vsel %vm302_vm7, %v1275_v60, -inf }
 0xc85   :  { %1280 = vmax.xlane.f32.xlu1 %v1279_v62  ;;  %2799 = vmatpush3.bf16.msra.mxu1 %v3143_v38 }
 0xc86   :  { %2800 = vmatprep.subr.bf16.mxu1 %v2943_v33  ;;  %2679 = vmatprep.mubr.msk.f32.mxu1 %vm2936_vm5, %v2935_v21 }
 0xc89   :  { %2802 = vmatpush3.bf16.msra.mxu1 %v3149_v41 }
 0xc8a   :  { %2693 = vmatprep.subr.mxu1 %v2935_v21 }
 0xc96   :  { %1290 = vrot.lane.b32.xlu1 %v3093_v1, %s2939_s2 }
 0xc9a   :  { %1674 = vrot.lane.b32.xlu1 %v3245_v34, %s2942_s28 }
 0xd12   :  { %v1281_v63 = vpop.xlane.xlu1 %1280 }
 0xd13   :  { %v1282_v38 = vsub.f32 %v1275_v60, %v1281_v63  ;;  %v2455_v60 = vld [vmem:[%s3485_s4] ss:$0 sm:$0xff]  ;;  %s2948_s4 = smov 8  }
 0xd15   :  { %v1283_v5 = vmul.f32 1.442695, %v1282_v38 }
 0xd16   :  { %v1291_v3 = vpop.permute.xlu1 %1290 }
 0xd17   :  { %2657 = vmatpush3.msra.mxu0 %v1291_v3  ;;  %2887 = vpow2.f32 %v1283_v5 }
 0xd18   :  { %2666 = vmatprep.subr.mxu0 %v2935_v21 }
 0xd21   :  { %v2888_v12 = vpop.eup %2887 }
 0xd22   :  { %v1285_v13 = vsel %vm302_vm7, %v2888_v12, 0.0 }
 0xd53   :  { %v1172_v8 = vpop.f32.mrb[10].mxu1 }
 0xd54   :  { %v3301_v9 = vadd.f32 %v1172_v8, %v937_v45  ;;  %v2650_v41 = vpop.f32.mrb[11].mxu1 }
 0xd56   :  { %v1199_v62 = vadd.f32 %v2455_v60, %v3301_v9 }
 0xd57   :  { %v1440_v10 = vpop.f32.mrb[12].mxu1 }
 0xd58   :  { %v2665_v11 = vpop.f32.mrb[13].mxu1  ;;  %v1444_v6 = vsel %vm302_vm7, %v1440_v10, -inf  ;;  %v3370_v38 = vadd.f32 %v1199_v62, %v3021_v0 }
 0xd59   :  { %1445 = vmax.xlane.f32.xlu0 %v1444_v6 }
 0xd5a   :  { %v2176_v9 = vsel %vm45_vm0, %v3370_v38, 0.0 }
 0xd5d   :  { %1286 = vadd.xlane.f32.xlu0 %v1285_v13 }
 0xde6   :  { %v1446_v15 = vpop.xlane.xlu0 %1445 }
 0xde7   :  { %v1447_v16 = vsub.f32 %v1440_v10, %v1446_v15 }
 0xde9   :  { %v1448_v17 = vmul.f32 1.442695, %v1447_v16 }
 0xdea   :  { %v1287_v20 = vpop.xlane.xlu0 %1286 }
 0xdeb   :  { %2889 = vpow2.f32 %v1448_v17 }
 0xdec   :  { %2891 = vrcp.f32 %v1287_v20 }
 0xdf5   :  { %v2890_v22 = vpop.eup %2889 }
 0xdf6   :  { %v2892_v23 = vpop.eup %2891  ;;  %v1450_v24 = vsel %vm302_vm7, %v2890_v22, 0.0 }
 0xdf7   :  { %v3306_v25 = vmul.f32 %v2892_v23, %v2888_v12  ;;  %1451 = vadd.xlane.f32.xlu0 %v1450_v24 }
 0xdf9   :  { %2659 = vmatmul.mubr.msk.f32.vlgmr.msra.gmra.mrb[18].mxu0 %vm302_vm7, %v3306_v25 }
 0xdfa   :  { %2667 = vmatpush3.msra.mxu0 %v3095_v4  ;;  %2668 = vmatprep.mubr.msk.f32.mxu0 %vm2936_vm5, %v2935_v21 }
 0xdfb   :  { %2803 = vmatprep.subr.bf16.mxu0 %v2943_v33 }
 0xe0d   :  { %1676 = vrot.lane.b32.xlu0 %v3093_v1, %s2941_s27  ;;  %s2950_s27 = smov 24  }
 0xe84   :  { %v1452_v26 = vpop.xlane.xlu0 %1451 }
 0xe85   :  { %2893 = vrcp.f32 %v1452_v26 }
 0xe88   :  { %v1677_v32 = vpop.permute.xlu0 %1676 }
 0xe8f   :  { %v2894_v27 = vpop.eup %2893 }
 0xe90   :  { %v3316_v28 = vmul.f32 %v2894_v27, %v2890_v22 }
 0xe92   :  { %2669 = vmatmul.mubr.msk.f32.vlgmr.msra.gmra.mrb[20].mxu0 %vm302_vm7, %v3316_v28 }
 0xe93   :  { %2805 = vmatpush3.bf16.msra.mxu0 %v3160_v46  ;;  %2690 = vmatprep.mubr.msk.f32.mxu0 %vm2936_vm5, %v2935_v21  ;;  %v1675_v46 = vpop.permute.xlu1 %1674 }
 0xe94   :  { %2806 = vmatprep.subr.bf16.mxu0 %v2943_v33 }
 0xe97   :  { %2808 = vmatpush3.bf16.msra.mxu0 %v3173_v50 }
 0xe98   :  { %2698 = vmatprep.subr.mxu0 %v2935_v21 }
 0xecc   :  { %v1362_v29 = vpop.f32.mrb[18].mxu0 }
 0xecd   :  { %v2660_v30 = vpop.f32.mrb[19].mxu0  ;;  %2691 = vmatmul.mubr.msk.f32.vlgmr.msra.gmra.mrb[22].mxu0 %vm45_vm0, %v1362_v29 }
 0xece   :  { %2700 = vmatprep.mubr.msk.f32.mxu0 %vm2936_vm5, %v2935_v21 }
 0xf65   :  { %v1524_v31 = vpop.f32.mrb[20].mxu0 }
 0xf66   :  { %v2670_v36 = vpop.f32.mrb[21].mxu0  ;;  %2680 = vmatmul.mubr.msk.f32.vlgmr.msra.gmra.mrb[14].mxu1 %vm45_vm0, %v1524_v31 }
 0xf67   :  { %2694 = vmatpush3.xpose.msk.msra.mxu1 %vm226_vm6, %v1677_v32  ;;  %2695 = vmatprep.mubr.msk.f32.mxu1 %vm2936_vm5, %v2935_v21 }
 0xf68   :  { %2809 = vmatprep.subr.bf16.mxu1 %v2943_v33 }
 0xf6a   :  { %2696 = vmatmul.mubr.msk.f32.vlgmr.msra.gmra.mrb[16].mxu1 %vm226_vm6, %v1675_v46 }
 0xf6b   :  { %2811 = vmatpush3.bf16.msra.mxu1 %v3211_v14  ;;  %2711 = vmatprep.mubr.msk.f32.mxu1 %vm2936_vm5, %v2935_v21 }
 0xf6c   :  { %2812 = vmatprep.subr.bf16.mxu1 %v2943_v33 }
 0xf6f   :  { %2814 = vmatpush3.bf16.msra.mxu1 %v3217_v59 }
 0xf70   :  { %2815 = vmatprep.subr.bf16.mxu1 %v2943_v33 }
 0xfa0   :  { %v1670_v50 = vpop.f32.mrb[22].mxu0 }
 0xfa1   :  { %v2692_v37 = vpop.f32.mrb[23].mxu0 }
0x1039   :  { %v1597_v39 = vpop.f32.mrb[14].mxu1 }
0x103a   :  { %v3341_v7 = vadd.f32 %v1670_v50, %v1597_v39  ;;  %v2681_v44 = vpop.f32.mrb[15].mxu1 }
0x103d   :  { %v1748_v45 = vpop.f32.mrb[16].mxu1 }
0x103e   :  { %v2697_v48 = vpop.f32.mrb[17].mxu1  ;;  %v1752_v49 = vsel %vm302_vm7, %v1748_v45, -inf }
0x103f   :  { %1753 = vmax.xlane.f32.xlu1 %v1752_v49 }
0x1050   :  { %1916 = vrot.lane.b32.xlu1 %v3093_v1, %s2946_s30 }
0x1054   :  { %1914 = vrot.lane.b32.xlu1 %v3245_v34, %s2945_s29 }
0x10cc   :  { %v1754_v14 = vpop.xlane.xlu1 %1753 }
0x10cd   :  { %v1755_v59 = vsub.f32 %v1748_v45, %v1754_v14 }
0x10cf   :  { %v1756_v51 = vmul.f32 1.442695, %v1755_v59 }
0x10d0   :  { %v1917_v57 = vpop.permute.xlu1 %1916 }
0x10d1   :  { %2895 = vpow2.f32 %v1756_v51 }
0x10d4   :  { %v1915_v58 = vpop.permute.xlu1 %1914 }
0x10db   :  { %v2896_v52 = vpop.eup %2895 }
0x10dc   :  { %v1758_v54 = vsel %vm302_vm7, %v2896_v52, 0.0 }
0x10dd   :  { %1759 = vadd.xlane.f32.xlu0 %v1758_v54  ;;  %v2221_v54 = vld [vmem:[%s3486_s5 + $0x8] sm:$0xff] }
0x10f3   :  { %1764 = vrot.lane.b32.xlu0 %v3095_v4, %s2944_s10 }
0x116a   :  { %v1760_v55 = vpop.xlane.xlu0 %1759 }
0x116b   :  { %2897 = vrcp.f32 %v1760_v55 }
0x116e   :  { %v1765_v56 = vpop.permute.xlu0 %1764 }
0x116f   :  { %2699 = vmatpush3.msra.mxu0 %v1765_v56  ;;  %v2223_v56 = vld [vmem:[%s3486_s5 + $0x18] sm:$0xff] }
0x1170   :  { %2714 = vmatprep.subr.mxu0 %v2935_v21 }
0x1175   :  { %v2898_v1 = vpop.eup %2897 }
0x1176   :  { %v1762_v34 = vmul.f32 %v2898_v1, %v2896_v52  ;;  %v2220_v52 = vld [vmem:[%s3486_s5] sm:$0xff] }
0x1177   :  { %v2821_v55 = vpack.c.bf16 %v2221_v54, %v2220_v52 }
0x1178   :  { %2701 = vmatmul.mubr.msk.f32.vlgmr.msra.gmra.mrb[24].mxu0 %vm302_vm7, %v1762_v34 }
0x1179   :  { %2715 = vmatpush3.xpose.msk.msra.mxu0 %vm226_vm6, %v1917_v57  ;;  %2716 = vmatprep.mubr.msk.f32.mxu0 %vm2936_vm5, %v2935_v21  ;;  %v2314_v57 = vld [vmem:[%s3488_s7] sm:$0xff] }
0x117a   :  { %2719 = vmatprep.subr.mxu0 %v2935_v21 }
0x117c   :  { %2717 = vmatmul.mubr.msk.f32.vlgmr.msra.gmra.mrb[26].mxu0 %vm226_vm6, %v1915_v58  ;;  %v2316_v58 = vld [vmem:[%s3488_s7 + $0x10] sm:$0xff] }
0x117d   :  { %2721 = vmatprep.mubr.msk.f32.mxu0 %vm2936_vm5, %v2935_v21 }
0x124b   :  { %v1836_v61 = vpop.f32.mrb[24].mxu0 }
0x124c   :  { %v2702_v63 = vpop.f32.mrb[25].mxu0  ;;  %2712 = vmatmul.mubr.msk.f32.vlgmr.msra.gmra.mrb[18].mxu1 %vm45_vm0, %v1836_v61  ;;  %v2317_v61 = vld [vmem:[%s3488_s7 + $0x18] sm:$0xff] }
0x124d   :  { %2817 = vmatpush3.bf16.msra.mxu1 %v3258_v42  ;;  %2732 = vmatprep.mubr.msk.f32.mxu1 %vm2936_vm5, %v2935_v21  ;;  %v2833_v62 = vpack.c.bf16 %v2317_v61, %v2316_v58  ;;  %v2318_v63 = vld [vmem:[%s3488_s7 + $0x20] sm:$0xff] }
0x124e   :  { %2818 = vmatprep.subr.bf16.mxu1 %v2943_v33 }
0x124f   :  { %v1988_v3 = vpop.f32.mrb[26].mxu0 }
0x1250   :  { %v2718_v5 = vpop.f32.mrb[27].mxu0  ;;  %v1992_v8 = vsel %vm302_vm7, %v1988_v3, -inf }
0x1251   :  { %1993 = vmax.xlane.f32.xlu1 %v1992_v8  ;;  %2820 = vmatpush3.bf16.msra.mxu1 %v3264_v43 }
0x1255   :  { %2177 = vadd.xlane.f32.xlu1 %v2176_v9 }
0x12de   :  { %v1994_v42 = vpop.xlane.xlu1 %1993 }
0x12df   :  { %v1995_v41 = vsub.f32 %v1988_v3, %v1994_v42  ;;  %v2319_v3 = vld [vmem:[%s3488_s7 + $0x28] sm:$0xff] }
0x12e0   :  { %v2837_v5 = vpack.c.bf16 %v2319_v3, %v2318_v63 }
0x12e1   :  { %v1996_v10 = vmul.f32 1.442695, %v1995_v41 }
0x12e3   :  { %2899 = vpow2.f32 %v1996_v10 }
0x12ed   :  { %v2900_v21 = vpop.eup %2899 }
0x12ee   :  { %v1998_v33 = vsel %vm302_vm7, %v2900_v21, 0.0 }
0x12ef   :  { %1999 = vadd.xlane.f32.xlu0 %v1998_v33 }
0x1305   :  { %2003 = vrot.lane.b32.xlu0 %v3095_v4, %s2947_s21 }
0x1309   :  { %2153 = vrot.lane.b32.xlu0 %v3316_v28, %s2948_s4 }
0x130d   :  { %1180 = vrot.lane.b32.xlu0 %v3222_v18, %s2949_s26  ;;  %v2178_v18 = vpop.xlane.xlu1 %2177 }
0x130e   :  { %v2182_v17 = vmul.f32 0.03125, %v2178_v18 }
0x1310   :  { %v2184_v23 = vsub.f32 %v3370_v38, %v2182_v17 }
0x1311   :  { %2156 = vrot.lane.b32.xlu0 %v1762_v34, %s2949_s26  ;;  %v2315_v34 = vld [vmem:[%s3488_s7 + $0x8] sm:$0xff] }
0x1312   :  { %v2186_v28 = vmul.f32 %v2184_v23, %v2184_v23  ;;  %v2214_v49 = vmul.f32 %v3066_v35, %v2184_v23 }
0x1314   :  { %v2188_v29 = vsel %vm45_vm0, %v2186_v28, 0.0 }
0x1315   :  { %1183 = vrot.lane.b32.xlu0 %v3271_v53, %s2950_s27 }
0x131f   :  { %v1909_v0 = vpop.f32.mrb[18].mxu1 }
0x1320   :  { %v1913_v43 = vadd.f32 %v1909_v0, %v3341_v7  ;;  %v2713_v11 = vpop.f32.mrb[19].mxu1 }
0x137c   :  { %v2000_v6 = vpop.xlane.xlu0 %1999 }
0x137d   :  { %2901 = vrcp.f32 %v2000_v6 }
0x1380   :  { %v2004_v12 = vpop.permute.xlu0 %2003 }
0x1381   :  { %2720 = vmatpush3.msra.mxu0 %v2004_v12 }
0x1382   :  { %2822 = vmatprep.subr.bf16.mxu0 %v2821_v55 }
0x1384   :  { %v2154_v8 = vpop.permute.xlu0 %2153 }
0x1385   :  { %v2162_v11 = vsel %vm302_vm7, %v3306_v25, %v2154_v8 }
0x1387   :  { %v2902_v4 = vpop.eup %2901 }
0x1388   :  { %v2002_v13 = vmul.f32 %v2902_v4, %v2900_v21  ;;  %v1181_v9 = vpop.permute.xlu0 %1180 }
0x138a   :  { %2722 = vmatmul.mubr.msk.f32.vlgmr.msra.gmra.mrb[28].mxu0 %vm302_vm7, %v2002_v13 }
0x138b   :  { %2824 = vmatpush3.bf16.msra.mxu0 %v2821_v55 }
0x138c   :  { %v2157_v42 = vpop.permute.xlu0 %2156 }
0x138d   :  { %v2163_v12 = vsel %vm1187_vm11, %v2162_v11, %v2157_v42 }
0x1390   :  { %v1184_v0 = vpop.permute.xlu0 %1183 }
0x145d   :  { %v2075_v15 = vpop.f32.mrb[28].mxu0 }
0x145e   :  { %v2723_v16 = vpop.f32.mrb[29].mxu0  ;;  %2733 = vmatmul.mubr.msk.f32.vlgmr.msra.gmra.mrb[20].mxu1 %vm45_vm0, %v2075_v15 }
0x1531   :  { %v2148_v20 = vpop.f32.mrb[20].mxu1 }
0x1532   :  { %v2152_v53 = vadd.f32 %v2148_v20, %v1913_v43  ;;  %v2734_v22 = vpop.f32.mrb[21].mxu1 }
0x1534   :  { %v2173_v24 = vadd.f32 %v2455_v60, %v2152_v53  ;;  %v2829_v60 = vpack.c.bf16 %v2315_v34, %v2314_v57 }
0x1536   :  { %v3389_v26 = vadd.f32 %v2173_v24, %v3028_v2  ;;  %2830 = vmatprep.subr.bf16.mxu1 %v2829_v60  ;;  %v2320_v24 = vld [vmem:[%s3488_s7 + $0x30] sm:$0xff] }
0x1537   :  { %2832 = vmatpush3.bf16.msra.mxu1 %v2829_v60 }
0x1538   :  { %v2179_v27 = vsel %vm45_vm0, %v3389_v26, 0.0  ;;  %2834 = vmatprep.subr.bf16.mxu1 %v2833_v62 }
0x1539   :  { %2180 = vadd.xlane.f32.xlu1 %v2179_v27  ;;  %v2321_v27 = vld [vmem:[%s3488_s7 + $0x38] sm:$0xff]  ;;  %s2951_s7 = smov [#allocation2]  }
0x153a   :  { %v2841_v28 = vpack.c.bf16 %v2321_v27, %v2320_v24  ;;  %s2420_s16 = sshll.u32 %s2951_s7, 4  ;;  %s2421_s16 = int_to_ptr.vmem [resolvable:$true] %s2420_s16 }
0x153b   :  { %2836 = vmatpush3.bf16.msra.mxu1 %v2833_v62  ;;  %p2916_p1 = scmp.lt.s32.totalorder %s2421_s16, %s2421_s16 }
0x153c   :  { %2838 = vmatprep.subr.bf16.mxu1 %v2837_v5 }
0x153d   :  { %2189 = vadd.xlane.f32.xlu1 %v2188_v29 }
0x153f   :  { %2840 = vmatpush3.bf16.msra.mxu1 %v2837_v5 }
0x1540   :  { %2842 = vmatprep.subr.bf16.mxu1 %v2841_v28 }
0x1543   :  { %2844 = vmatpush3.bf16.msra.mxu1 %v2841_v28 }
0x15c6   :  { %v2181_v30 = vpop.xlane.xlu1 %2180 }
0x15c7   :  { %v2183_v31 = vmul.f32 0.03125, %v2181_v30 }
0x15c9   :  { %v3395_v32 = vsub.f32 %v3389_v26, %v2183_v31 }
0x15ca   :  { %v2190_v36 = vpop.xlane.xlu1 %2189 }
0x15cb   :  { %v2194_v46 = vmul.f32 0.032258064, %v2190_v36  ;;  %v2187_v50 = vmul.f32 %v3395_v32, %v3395_v32  ;;  %v2215_v20 = vmul.f32 %v3066_v35, %v3395_v32  ;;  %v2473_v35 = vld [vmem:[%s3487_s6] ss:$0 sm:$0xff]  ;;  %s2911_s6 = scalar_lea.vmem %s2421_s16, 256 }
0x15cc   :  { %p2912_p0 = scmp.ne.s32.totalorder %s2421_s16, %s2911_s6  ;;  %p2917_p2 = scmp.lt.s32.totalorder %s2911_s6, %s2911_s6 }
0x15cd   :  { %2903 = vrsqrt.f32 %v2194_v46  ;;  %v2191_v2 = vsel %vm45_vm0, %v2187_v50, 0.0  ;;  %vm2198_vm8 = vcmp.eq.f32.partialorder %v2194_v46, inf  ;;  %v2201_v7 = vand.u32 2147483648, %v2194_v46 }
0x15ce   :  { %2192 = vadd.xlane.f32.xlu1 %v2191_v2  ;;  %vm2200_vm9 = vcmp.eq.f32.partialorder %v2194_v46, 0.0  ;;  %p2918_p3 = por %p2917_p2, %p2916_p1 }
0x15d0   :  { %p2919_p4 = pnand %p2918_p3, %p2912_p0 }
0x15d7   :  { %v2904_v37 = vpop.eup %2903 }
0x15d8   :  { %v2197_v39 = vmul.f32 %v2904_v37, %v2194_v46 }
0x15da   :  { %v2199_v44 = vsel %vm2198_vm8, %v2194_v46, %v2197_v39  ;;  %v2476_v46 = vld [vmem:[%s3489_s8] ss:$0 sm:$0xff] }
0x15db   :  { %v2202_v45 = vsel %vm2200_vm9, %v2201_v7, %v2199_v44 }
0x15dc   :  { %v2210_v48 = vadd.f32 1e-06, %v2202_v45 }
0x15de   :  { %2905 = vrcp.f32 %v2210_v48 }
0x15df   :  { %1177 = vrot.lane.b32.xlu1 %v3162_v47, %s2948_s4  ;;  %v2222_v47 = vld [vmem:[%s3486_s5 + $0x10] sm:$0xff] }
0x15e0   :  { %v2825_v1 = vpack.c.bf16 %v2223_v56, %v2222_v47 }
0x15e2   :  { %2826 = vmatprep.subr.bf16.mxu0 %v2825_v1 }
0x15e3   :  { %2159 = vrot.lane.b32.xlu1 %v2002_v13, %s2950_s27  ;;  %2828 = vmatpush3.bf16.msra.mxu0 %v2825_v1 }
0x15e8   :  { %v2906_v14 = vpop.eup %2905 }
0x15e9   :  { %v2216_v59 = vmul.f32 %v2906_v14, %v2214_v49 }
0x15eb   :  { %v2218_v51 = vadd.f32 %v3072_v40, %v2216_v59 }
0x15ed   :  { %2743 = vmatprep.mubr.msk.f32.mxu0 %vm45_vm0, %v2218_v51 }
0x165b   :  { %v2193_v41 = vpop.xlane.xlu1 %2192 }
0x165c   :  { %v2195_v10 = vmul.f32 0.032258064, %v2193_v41 }
0x165e   :  { %2907 = vrsqrt.f32 %v2195_v10  ;;  %vm2205_vm12 = vcmp.eq.f32.partialorder %v2195_v10, inf  ;;  %v2208_v16 = vand.u32 2147483648, %v2195_v10  ;;  %vm2207_vm13 = vcmp.eq.f32.partialorder %v2195_v10, 0.0 }
0x165f   :  { %v1178_v21 = vpop.permute.xlu1 %1177 }
0x1660   :  { %v1186_v33 = vsel %vm302_vm7, %v3116_v19, %v1178_v21 }
0x1661   :  { %v1188_v43 = vsel %vm1187_vm11, %v1186_v33, %v1181_v9 }
0x1662   :  { %v1190_v6 = vsel %vm1189_vm10, %v1188_v43, %v1184_v0 }
0x1663   :  { %1191 = vst.msk [vmem:[%s3493_s12] sm:$0xff] %vm45_vm0, %v1190_v6  ;;  %v2160_v4 = vpop.permute.xlu1 %2159 }
0x1664   :  { %v2164_v13 = vsel %vm1189_vm10, %v2163_v12, %v2160_v4 }
0x1665   :  { %2165 = vst.msk [vmem:[%s3493_s12 + $0x8] sm:$0xff] %vm45_vm0, %v2164_v13 }
0x1668   :  { %v2908_v19 = vpop.eup %2907 }
0x1669   :  { %v2204_v15 = vmul.f32 %v2908_v19, %v2195_v10 }
0x166b   :  { %v2206_v18 = vsel %vm2205_vm12, %v2195_v10, %v2204_v15 }
0x166c   :  { %v2209_v25 = vsel %vm2207_vm13, %v2208_v16, %v2206_v18 }
0x166d   :  { %v2211_v17 = vadd.f32 1e-06, %v2209_v25 }
0x166f   :  { %2909 = vrcp.f32 %v2211_v17 }
0x1679   :  { %v2910_v53 = vpop.eup %2909 }
0x167a   :  { %v2217_v22 = vmul.f32 %v2910_v53, %v2215_v20 }
0x167c   :  { %v2219_v23 = vadd.f32 %v3072_v40, %v2217_v22 }
0x167e   :  { %2744 = vmatmul.mubr.msk.f32.vlgmr.msra.gmra.mrb[30].mxu0 %vm45_vm0, %v2219_v23 }
0x1751   :  { %v2745_v29 = vpop.f32.mrb[30].mxu0 }
0x1752   :  { %v2309_v30 = vadd.f32 %v2745_v29, %v2473_v35  ;;  %v2303_v40 = vpop.f32.mrb[31].mxu0 }
0x1753   :  { %v2304_v31 = vadd.f32 %v2473_v35, %v2303_v40 }
0x1754   :  { %v2313_v36 = vmax.f32 %v2309_v30, 0.0 }
0x1755   :  { %v2312_v32 = vmax.f32 %v2304_v31, 0.0 }
0x1757   :  { %2762 = vmatprep.mubr.msk.f32.mxu1 %vm2329_vm14, %v2312_v32 }
0x1758   :  { %2763 = vmatmul.mubr.msk.f32.vlgmr.msra.gmra.mrb[22].mxu1 %vm2329_vm14, %v2313_v36 }
0x182b   :  { %v2764_v50 = vpop.f32.mrb[22].mxu1 }
0x182c   :  { %v2408_v2 = vadd.f32 %v2764_v50, %v2476_v46  ;;  %v2402_v37 = vpop.f32.mrb[23].mxu1 }
0x182d   :  { %v2403_v39 = vadd.f32 %v2476_v46, %v2402_v37 }
0x182e   :  { %v2412_v7 = vadd.f32 %v2408_v2, %v3389_v26 }
0x182f   :  { %v2411_v44 = vadd.f32 %v2403_v39, %v3370_v38 }
0x1830   :  { %2414 = vst.msk [vmem:[#allocation2 + $0x8] sm:$0xff] %vm45_vm0, %v2412_v7 }
0x1831   :  { %2413 = vst.msk [vmem:[#allocation2] sm:$0xff] %vm45_vm0, %v2411_v44 }
0x1832   :  { %2922 = shalt.err (!%p2919_p4)
}
0x1833   :  { %s2923_s18 = scalar_lea.hbm %s3492_s11, 256 }
0x1834   :  { %p2924_p5 = scmp.ne.s32.totalorder %s3492_s11, %s2923_s18  ;;  %p2927_p6 = scmp.lt.u32.totalorder %s2923_s18, %s3492_s11 }
0x1836   :  { %p2929_p7 = pnand %p2927_p6, %p2924_p5 }
0x1838   :  { %2932 = shalt.err (!%p2929_p7)
}
0x1839   :  { %s2952_s25 = smov 128  }
0x183a   :  { %2426 = dma.vmem_to_hbm [thread:$0]  %s2421_s16, 256, %s3492_s11, [#allocation3], %s2952_s25, %s2952_s25, %s2948_s4  }
0x183b   :  { %2933 = dma.done.wait [#allocation3], 256  }
0x183c   :  { %2934 = vsyncadd [#allocation3], 4294967040 }
0x183d   :  { %2434 = vsyncpa [#allocation3], 1 }

</bundles_post_ra>
